<compile_context>
chip_gen: v7x
topology: tpu7x:2x2x1
jax: 0.10.0
libtpu: 0.0.40
codegen_flags: <defaults>
</compile_context>

<pallas_src>
import numpy as np
import jax
import jax.numpy as jnp
from jax import lax
from jax.experimental import pallas as pl
from jax.experimental.pallas import tpu as pltpu


# ---------------------------------------------------------------------------
# Deterministic parameter construction (no learned weights in this module).
# ---------------------------------------------------------------------------
def _hz_to_mel_slaney(f):
    f = np.asarray(f, dtype=np.float64)
    f_sp = 200.0 / 3
    mels = f / f_sp
    min_log_hz = 1000.0
    min_log_mel = min_log_hz / f_sp
    logstep = np.log(6.4) / 27.0
    return np.where(f >= min_log_hz,
                    min_log_mel + np.log(np.maximum(f, 1e-12) / min_log_hz) / logstep,
                    mels)


def _mel_to_hz_slaney(m):
    m = np.asarray(m, dtype=np.float64)
    f_sp = 200.0 / 3
    freqs = f_sp * m
    min_log_hz = 1000.0
    min_log_mel = min_log_hz / f_sp
    logstep = np.log(6.4) / 27.0
    return np.where(m >= min_log_mel,
                    min_log_hz * np.exp(logstep * (m - min_log_mel)),
                    freqs)


def _mel_filterbank(sr, n_fft, n_mels):
    """librosa.filters.mel equivalent (slaney scale + norm) -> (n_mels, n_fft//2+1)."""
    fmin, fmax = 0.0, sr / 2.0
    n_bins = n_fft // 2 + 1
    fftfreqs = np.linspace(0.0, sr / 2.0, n_bins)
    mel_f = _mel_to_hz_slaney(np.linspace(_hz_to_mel_slaney(fmin),
                                          _hz_to_mel_slaney(fmax), n_mels + 2))
    fdiff = np.diff(mel_f)
    ramps = mel_f[:, None] - fftfreqs[None, :]
    weights = np.zeros((n_mels, n_bins), dtype=np.float64)
    for i in range(n_mels):
        lower = -ramps[i] / fdiff[i]
        upper = ramps[i + 2] / fdiff[i + 1]
        weights[i] = np.maximum(0.0, np.minimum(lower, upper))
    enorm = 2.0 / (mel_f[2:n_mels + 2] - mel_f[:n_mels])
    weights *= enorm[:, None]
    return weights.astype(np.float32)


def _round_up(x, m):
    return ((x + m - 1) // m) * m


# ---------------------------------------------------------------------------
# Pallas kernel: hop-chunk DFT decomposition -> power -> bf16 mel matmul ->
# log10 -> mask invalid frames -> masked log-mel + accumulated per-item sums.
# ---------------------------------------------------------------------------
def _frontend_kernel(lens_ref, c_ref, h_ref, w_ref, melT_ref, logmel_ref, sum_ref):
    b = pl.program_id(0)
    t = pl.program_id(1)
    tile_t = logmel_ref.shape[0]
    hop = c_ref.shape[1]
    n_blk = w_ref.shape[0] // hop            # hop-row blocks of W (3 for 16 kHz defaults)
    n_valid = lens_ref[b]                    # valid frame count of this utterance (SMEM)

    c = c_ref[...]                           # (tile_t, hop) bf16 : chunk rows t..t+tile_t-1
    # halo = first chunks of the next tile; build shifted views via sublane rolls (f32).
    cc = jnp.concatenate([c.astype(jnp.float32),
                          h_ref[...].astype(jnp.float32)], axis=0)   # (tile_t+16, hop)
    n_cc = cc.shape[0]

    # Windowed DFT: frame f = sum_j chunk[f+j] @ W[j*hop:(j+1)*hop].
    # (K=160 per block pads to the MXU K tile; accepted for layout-safe ops.)
    dft = jnp.dot(c, w_ref[0:hop, :], preferred_element_type=jnp.float32)
    for j in range(1, n_blk):
        xj = pltpu.roll(cc, n_cc - j, 0)[:tile_t].astype(jnp.bfloat16)   # rows j..j+tile_t-1
        dft = dft + jnp.dot(xj, w_ref[j * hop:(j + 1) * hop, :],
                            preferred_element_type=jnp.float32)

    nb = dft.shape[1] // 2
    re = dft[:, :nb]
    im = dft[:, nb:]
    power = (re * re + im * im).astype(jnp.bfloat16)                  # |STFT|^2
    mel = jnp.dot(power, melT_ref[...], preferred_element_type=jnp.float32)
    logmel = jnp.log10(jnp.maximum(mel, 1e-10))

    t_ids = t * tile_t + lax.broadcasted_iota(jnp.int32, logmel.shape, 0)
    masked = jnp.where(t_ids < n_valid, logmel, 0.0)                  # pad frames -> exactly 0
    logmel_ref[...] = masked

    # per-utterance sum, accumulated across the "arbitrary" t axis (output resident in VMEM)
    @pl.when(t == 0)
    def _():
        sum_ref[...] = jnp.zeros_like(sum_ref)
    sum_ref[...] += jnp.sum(masked, axis=0, keepdims=True)


def _mel_frontend_call(feat_lens, chunks, W, melT, tile_t, t_pad):
    B = chunks.shape[0]
    hop = chunks.shape[2]
    k_rows, two_nb = W.shape
    nb = two_nb // 2
    n_mels_pad = melT.shape[1]
    n_tiles = t_pad // tile_t

    grid_spec = pltpu.PrefetchScalarGridSpec(
        num_scalar_prefetch=1,
        grid=(B, n_tiles),
        in_specs=[
            # main chunk window of this time tile
            pl.BlockSpec((None, tile_t, hop), lambda b, t, lens: (b, t, 0)),
            # 16-chunk halo = first chunks after the main window (same HBM array)
            pl.BlockSpec((None, 16, hop),
                         lambda b, t, lens: (b, (t + 1) * (tile_t // 16), 0)),
            pl.BlockSpec((k_rows, two_nb), lambda b, t, lens: (0, 0)),
            pl.BlockSpec((nb, n_mels_pad), lambda b, t, lens: (0, 0)),
        ],
        out_specs=(
            pl.BlockSpec((None, tile_t, n_mels_pad), lambda b, t, lens: (b, t, 0)),
            pl.BlockSpec((None, 1, n_mels_pad), lambda b, t, lens: (b, 0, 0)),
        ),
    )

    flops = 2 * B * t_pad * (k_rows * two_nb + nb * n_mels_pad)
    transcendentals = B * t_pad * n_mels_pad
    bytes_accessed = (B * (t_pad + 16) * hop * 2          # bf16 chunks
                      + k_rows * two_nb * 2               # bf16 DFT constant
                      + nb * n_mels_pad * 2               # bf16 mel basis
                      + B * t_pad * n_mels_pad * 4        # f32 log-mel out
                      + B * n_mels_pad * 4                # per-utterance sums
                      + B * 4)                            # lengths

    return pl.pallas_call(
        _frontend_kernel,
        out_shape=(jax.ShapeDtypeStruct((B, t_pad, n_mels_pad), jnp.float32),
                   jax.ShapeDtypeStruct((B, 1, n_mels_pad), jnp.float32)),
        grid_spec=grid_spec,
        compiler_params=pltpu.CompilerParams(
            dimension_semantics=("parallel", "arbitrary"),
            vmem_limit_bytes=32 * 1024 * 1024),
        cost_estimate=pl.CostEstimate(flops=flops,
                                      transcendentals=transcendentals,
                                      bytes_accessed=bytes_accessed),
    )(feat_lens, chunks, chunks, W, melT)


# ---------------------------------------------------------------------------
# Module-equivalent wrapper.
# ---------------------------------------------------------------------------
class WavFrontendMelPallas:
    def __init__(self, fs: int = 16000, n_mels: int = 80, frame_length: int = 25,
                 frame_shift: int = 10, context_size: int = 0, subsampling: int = 1):
        self.fs = fs
        self.frame_length = int(frame_length * fs / 1000)        # samples (400)
        self.frame_shift = int(frame_shift * fs / 1000)          # samples (160)
        self.context_size = context_size
        self.subsampling = subsampling
        self.n_mels = n_mels
        self.n_fft = 1 << (self.frame_length - 1).bit_length()   # next pow2 (512)
        n_bins = self.n_fft // 2                                  # Nyquist dropped (mel weight 0)
        hop = self.frame_shift

        # periodic Hann window, centered inside the n_fft frame (librosa pad_center)
        pad_l = (self.n_fft - self.frame_length) // 2
        w = 0.5 - 0.5 * np.cos(2.0 * np.pi * np.arange(self.frame_length) / self.frame_length)
        win = np.zeros(self.n_fft, dtype=np.float64)
        win[pad_l:pad_l + self.frame_length] = w

        # number of hop-row blocks that actually carry non-zero window values
        n_blk = -(-(pad_l + self.frame_length) // hop)            # = 3 for 16 kHz defaults
        assert n_blk - 1 <= 16, "halo of 16 chunks assumed"
        self.n_blk = n_blk
        k_rows = n_blk * hop

        # window folded into the DFT: W = diag(win) @ [cos | sin] -> (k_rows, 2*n_bins), bf16
        n = np.arange(k_rows, dtype=np.float64)[:, None]          # frame sample offset
        k = np.arange(n_bins, dtype=np.float64)[None, :]
        ang = 2.0 * np.pi * n * k / self.n_fft
        win_k = np.zeros(k_rows, dtype=np.float64)
        m = min(k_rows, self.n_fft)
        win_k[:m] = win[:m]
        Wc = win_k[:, None] * np.cos(ang)
        Ws = win_k[:, None] * np.sin(ang)
        self.W = jnp.asarray(np.concatenate([Wc, Ws], axis=1).astype(np.float32)
                             ).astype(jnp.bfloat16)               # (k_rows, 2*n_bins)

        # slaney mel basis, Nyquist column dropped (weight 0), transposed, padded to 128 lanes
        mel = _mel_filterbank(fs, self.n_fft, n_mels)[:, :n_bins]  # (n_mels, n_bins)
        self.n_mels_pad = _round_up(n_mels, 128)
        melT = np.zeros((n_bins, self.n_mels_pad), dtype=np.float32)
        melT[:, :n_mels] = mel.T
        self.melT = jnp.asarray(melT).astype(jnp.bfloat16)         # (n_bins, 128) bf16

    def output_size(self) -> int:
        return self.n_mels * (2 * self.context_size + 1)

    def forward(self, input, input_lengths):
        wav = jnp.asarray(input, dtype=jnp.float32)                # (B, L_max)
        B, L_max = wav.shape
        hop, n_fft = self.frame_shift, self.n_fft
        half = n_fft // 2

        lens_np = np.asarray(input_lengths).astype(np.int64)       # host, as in the reference
        feat_lens_np = (-(-lens_np // hop)).astype(np.int32)       # ceil(L / hop)
        T_max = int(feat_lens_np.max())

        # coarse time buckets: tile in {64,...,1024}, T padded to a multiple of the tile
        tile_t = 64
        while tile_t < min(T_max, 1024):
            tile_t *= 2
        T_pad = _round_up(T_max, tile_t)

        lengths = jnp.asarray(lens_np.astype(np.int32))
        feat_lens = jnp.asarray(feat_lens_np)

        # librosa center=True reflect padding + free reshape into hop-sample chunks.
        # TODO(synk): single-bounce reflect only; utterances shorter than n_fft/2+1
        # samples would need np.pad-style multi-bounce reflection.
        L_buf = (T_pad + 16) * hop
        padded = jnp.zeros((B, L_buf), jnp.float32)
        left = min(half, max(L_max - 1, 0))
        if left > 0:
            padded = padded.at[:, half - left:half].set(wav[:, 1:left + 1][:, ::-1])
        padded = padded.at[:, half:half + L_max].set(wav)

        def _right_reflect(p_row, w_row, L):
            seg = lax.dynamic_slice(w_row, (L - (half + 1),), (half,))[::-1]
            return lax.dynamic_update_slice(p_row, seg, (half + L,))

        padded = jax.vmap(_right_reflect)(padded, wav, lengths)
        chunks = padded.astype(jnp.bfloat16).reshape(B, T_pad + 16, hop)

        logmel, sums = _mel_frontend_call(feat_lens, chunks, self.W, self.melT,
                                          tile_t, T_pad)

        # per-utterance mean over valid frames (small XLA epilogue; heavy work in Pallas)
        denom = jnp.maximum(feat_lens, 1).astype(jnp.float32)[:, None]
        mean = sums[:, 0, :] / denom                               # (B, n_mels_pad)
        valid = (jnp.arange(T_pad, dtype=jnp.int32)[None, :]
                 < feat_lens[:, None])[:, :, None]
        feats = jnp.where(valid, logmel - mean[:, None, :], 0.0)   # pad frames stay exactly 0
        feats = feats[:, :T_max, :self.n_mels]

        if self.context_size != 0:
            # TODO(synk): eend_ola_feature.splice (context stacking) not implemented;
            # the reference default context_size=0 skips it as well.
            raise NotImplementedError("context splice not implemented")
        if self.subsampling != 1:
            feats = feats[:, ::self.subsampling]
            feat_lens = -(-feat_lens // self.subsampling)

        return feats, feat_lens.astype(jnp.int32)


if __name__ == "__main__":
    key = jax.random.PRNGKey(0)
    fs = 16000
    B = 2
    L_max = 3200                        # 0.2 s per item -> 20 frames max
    wav = jax.random.normal(key, (B, L_max), jnp.float32)
    lengths = np.array([3200, 2560], dtype=np.int32)

    frontend = WavFrontendMelPallas(fs=fs, n_mels=80)
    feats, feat_lens = frontend.forward(wav, lengths)
    feats = jax.block_until_ready(feats)
    feat_lens = jax.block_until_ready(feat_lens)

    assert feats.shape == (B, 20, frontend.n_mels), feats.shape
    assert feats.dtype == jnp.float32
    assert [int(x) for x in np.asarray(feat_lens)] == [20, 16]
    assert bool(jnp.all(jnp.isfinite(feats)))
    # padded frames of the shorter item must be exactly 0 (pad_sequence semantics)
    assert float(jnp.max(jnp.abs(feats[1, 16:]))) == 0.0
    print("KERNEL_OK")
</pallas_src>

<mosaic_0001>
module attributes {stable_mosaic.version = 11 : i64} {
  func.func @_frontend_kernel(%arg0: i32, %arg1: i32, %arg2: memref<2xi32, #tpu.memory_space<smem>>, %arg3: memref<1x64x160xbf16, #tpu.memory_space<vmem>>, %arg4: memref<1x16x160xbf16, #tpu.memory_space<vmem>>, %arg5: memref<480x512xbf16, #tpu.memory_space<vmem>>, %arg6: memref<256x128xbf16, #tpu.memory_space<vmem>>, %arg7: memref<1x64x128xf32, #tpu.memory_space<vmem>>, %arg8: memref<1x1x128xf32, #tpu.memory_space<vmem>>) attributes {dimension_semantics = [#tpu.dimension_semantics<parallel>, #tpu.dimension_semantics<arbitrary>], iteration_bounds = array<i64: 2, 1>, scalar_prefetch = 1 : i64, scratch_operands = 0 : i64, tpu.core_type = #tpu.core_type<tc>, window_params = [{transform_indices = @transform_0, window_bounds = array<i64: 1, 64, 160>}, {transform_indices = @transform_1, window_bounds = array<i64: 1, 16, 160>}, {pipeline_mode = #tpu.pipeline_mode<synchronous>, transform_indices = @transform_2, window_bounds = array<i64: 480, 512>}, {pipeline_mode = #tpu.pipeline_mode<synchronous>, transform_indices = @transform_3, window_bounds = array<i64: 256, 128>}, {transform_indices = @transform_4, window_bounds = array<i64: 1, 64, 128>}, {transform_indices = @transform_5, window_bounds = array<i64: 1, 1, 128>}]} {
    %0 = arith.index_cast %arg0 : i32 to index
    %1 = memref.load %arg2[%0] : memref<2xi32, #tpu.memory_space<smem>>
    %c0 = arith.constant 0 : index
    %c0_0 = arith.constant 0 : index
    %c0_1 = arith.constant 0 : index
    %2 = vector.load %arg3[%c0, %c0_0, %c0_1] : memref<1x64x160xbf16, #tpu.memory_space<vmem>>, vector<1x64x160xbf16>
    %3 = vector.shape_cast %2 : vector<1x64x160xbf16> to vector<64x160xbf16>
    %4 = arith.extf %3 : vector<64x160xbf16> to vector<64x160xf32>
    %c0_2 = arith.constant 0 : index
    %c0_3 = arith.constant 0 : index
    %c0_4 = arith.constant 0 : index
    %5 = vector.load %arg4[%c0_2, %c0_3, %c0_4] : memref<1x16x160xbf16, #tpu.memory_space<vmem>>, vector<1x16x160xbf16>
    %6 = vector.shape_cast %5 : vector<1x16x160xbf16> to vector<16x160xbf16>
    %7 = arith.extf %6 : vector<16x160xbf16> to vector<16x160xf32>
    %8 = tpu.concatenate %4, %7 in 0 : vector<64x160xf32>, vector<16x160xf32> -> vector<80x160xf32>
    %c0_5 = arith.constant 0 : index
    %c0_6 = arith.constant 0 : index
    %9 = vector.load %arg5[%c0_5, %c0_6] : memref<480x512xbf16, #tpu.memory_space<vmem>>, vector<160x512xbf16>
    %cst = arith.constant dense<0.000000e+00> : vector<64x512xf32>
    %10 = tpu.matmul %3, %9, %cst {dimension_numbers = #tpu.dot_dimension_numbers<[1], [0], [0], [1], [0, 0, 1, 1], [], []>} : vector<64x160xbf16>, vector<160x512xbf16>, vector<64x512xf32> -> vector<64x512xf32>
    %c79_i32 = arith.constant 79 : i32
    %11 = tpu.dynamic_rotate %8 by %c79_i32 dim 0 : vector<80x160xf32>, i32 -> vector<80x160xf32>
    %12 = vector.extract_strided_slice %11 {offsets = [0, 0], sizes = [64, 160], strides = [1, 1]} : vector<80x160xf32> to vector<64x160xf32>
    %13 = arith.truncf %12 : vector<64x160xf32> to vector<64x160xbf16>
    %c160 = arith.constant 160 : index
    %c0_7 = arith.constant 0 : index
    %14 = vector.load %arg5[%c160, %c0_7] : memref<480x512xbf16, #tpu.memory_space<vmem>>, vector<160x512xbf16>
    %cst_8 = arith.constant dense<0.000000e+00> : vector<64x512xf32>
    %15 = tpu.matmul %13, %14, %cst_8 {dimension_numbers = #tpu.dot_dimension_numbers<[1], [0], [0], [1], [0, 0, 1, 1], [], []>} : vector<64x160xbf16>, vector<160x512xbf16>, vector<64x512xf32> -> vector<64x512xf32>
    %16 = arith.addf %10, %15 : vector<64x512xf32>
    %c78_i32 = arith.constant 78 : i32
    %17 = tpu.dynamic_rotate %8 by %c78_i32 dim 0 : vector<80x160xf32>, i32 -> vector<80x160xf32>
    %18 = vector.extract_strided_slice %17 {offsets = [0, 0], sizes = [64, 160], strides = [1, 1]} : vector<80x160xf32> to vector<64x160xf32>
    %19 = arith.truncf %18 : vector<64x160xf32> to vector<64x160xbf16>
    %c320 = arith.constant 320 : index
    %c0_9 = arith.constant 0 : index
    %20 = vector.load %arg5[%c320, %c0_9] : memref<480x512xbf16, #tpu.memory_space<vmem>>, vector<160x512xbf16>
    %cst_10 = arith.constant dense<0.000000e+00> : vector<64x512xf32>
    %21 = tpu.matmul %19, %20, %cst_10 {dimension_numbers = #tpu.dot_dimension_numbers<[1], [0], [0], [1], [0, 0, 1, 1], [], []>} : vector<64x160xbf16>, vector<160x512xbf16>, vector<64x512xf32> -> vector<64x512xf32>
    %22 = arith.addf %16, %21 : vector<64x512xf32>
    %23 = vector.extract_strided_slice %22 {offsets = [0, 0], sizes = [64, 256], strides = [1, 1]} : vector<64x512xf32> to vector<64x256xf32>
    %24 = vector.extract_strided_slice %22 {offsets = [0, 256], sizes = [64, 256], strides = [1, 1]} : vector<64x512xf32> to vector<64x256xf32>
    %25 = arith.mulf %23, %23 : vector<64x256xf32>
    %26 = arith.mulf %24, %24 : vector<64x256xf32>
    %27 = arith.addf %25, %26 : vector<64x256xf32>
    %28 = arith.truncf %27 : vector<64x256xf32> to vector<64x256xbf16>
    %c0_11 = arith.constant 0 : index
    %c0_12 = arith.constant 0 : index
    %29 = vector.load %arg6[%c0_11, %c0_12] : memref<256x128xbf16, #tpu.memory_space<vmem>>, vector<256x128xbf16>
    %cst_13 = arith.constant dense<0.000000e+00> : vector<64x128xf32>
    %30 = tpu.matmul %28, %29, %cst_13 {dimension_numbers = #tpu.dot_dimension_numbers<[1], [0], [0], [1], [0, 0, 1, 1], [], []>} : vector<64x256xbf16>, vector<256x128xbf16>, vector<64x128xf32> -> vector<64x128xf32>
    %cst_14 = arith.constant 1.000000e-10 : f32
    %31 = vector.broadcast %cst_14 : f32 to vector<64x128xf32>
    %32 = arith.maximumf %30, %31 : vector<64x128xf32>
    %33 = math.log %32 : vector<64x128xf32>
    %cst_15 = arith.constant 0.434294492 : f32
    %34 = vector.broadcast %cst_15 : f32 to vector<64x128xf32>
    %35 = arith.mulf %33, %34 : vector<64x128xf32>
    %c64_i32 = arith.constant 64 : i32
    %36 = arith.muli %arg1, %c64_i32 : i32
    %37 = tpu.iota {dimensions = array<i32: 0>} : vector<64x128xi32>
    %38 = vector.broadcast %36 : i32 to vector<64x128xi32>
    %39 = arith.addi %38, %37 : vector<64x128xi32>
    %40 = vector.broadcast %1 : i32 to vector<64x128xi32>
    %41 = arith.cmpi slt, %39, %40 : vector<64x128xi32>
    %cst_16 = arith.constant 0.000000e+00 : f32
    %42 = vector.broadcast %cst_16 : f32 to vector<64x128xf32>
    %43 = arith.select %41, %35, %42 : vector<64x128xi1>, vector<64x128xf32>
    %c0_17 = arith.constant 0 : index
    %c0_18 = arith.constant 0 : index
    %c0_19 = arith.constant 0 : index
    %44 = vector.load %arg7[%c0_17, %c0_18, %c0_19] : memref<1x64x128xf32, #tpu.memory_space<vmem>>, vector<1x64x128xf32>
    %45 = vector.shape_cast %44 : vector<1x64x128xf32> to vector<64x128xf32>
    %46 = vector.shape_cast %43 : vector<64x128xf32> to vector<1x64x128xf32>
    tpu.vector_store %arg7[%c0_17, %c0_18, %c0_19], %46 {strides = array<i32>} : memref<1x64x128xf32, #tpu.memory_space<vmem>>, vector<1x64x128xf32>,
    %c0_i32 = arith.constant 0 : i32
    %47 = arith.cmpi eq, %arg1, %c0_i32 : i32
    %48 = arith.extui %47 : i1 to i32
    %c0_i32_20 = arith.constant 0 : i32
    %49 = arith.cmpi ne, %48, %c0_i32_20 : i32
    scf.if %49 {
      %cst_28 = arith.constant 0.000000e+00 : f32
      %58 = vector.broadcast %cst_28 : f32 to vector<1x128xf32>
      %c0_29 = arith.constant 0 : index
      %c0_30 = arith.constant 0 : index
      %c0_31 = arith.constant 0 : index
      %59 = vector.load %arg8[%c0_29, %c0_30, %c0_31] : memref<1x1x128xf32, #tpu.memory_space<vmem>>, vector<1x1x128xf32>
      %60 = vector.shape_cast %59 : vector<1x1x128xf32> to vector<1x128xf32>
      %61 = vector.shape_cast %58 : vector<1x128xf32> to vector<1x1x128xf32>
      tpu.vector_store %arg8[%c0_29, %c0_30, %c0_31], %61 {strides = array<i32>} : memref<1x1x128xf32, #tpu.memory_space<vmem>>, vector<1x1x128xf32>,
    } else {
    }
    %c0_21 = arith.constant 0 : index
    %c0_22 = arith.constant 0 : index
    %c0_23 = arith.constant 0 : index
    %50 = vector.load %arg8[%c0_21, %c0_22, %c0_23] : memref<1x1x128xf32, #tpu.memory_space<vmem>>, vector<1x1x128xf32>
    %51 = vector.shape_cast %50 : vector<1x1x128xf32> to vector<1x128xf32>
    %cst_24 = arith.constant dense<0.000000e+00> : vector<128xf32>
    %52 = vector.multi_reduction <add>, %43, %cst_24 [0] : vector<64x128xf32> to vector<128xf32>
    %53 = vector.shape_cast %52 : vector<128xf32> to vector<1x128xf32>
    %54 = arith.addf %51, %53 : vector<1x128xf32>
    %c0_25 = arith.constant 0 : index
    %c0_26 = arith.constant 0 : index
    %c0_27 = arith.constant 0 : index
    %55 = vector.load %arg8[%c0_25, %c0_26, %c0_27] : memref<1x1x128xf32, #tpu.memory_space<vmem>>, vector<1x1x128xf32>
    %56 = vector.shape_cast %55 : vector<1x1x128xf32> to vector<1x128xf32>
    %57 = vector.shape_cast %54 : vector<1x128xf32> to vector<1x1x128xf32>
    tpu.vector_store %arg8[%c0_25, %c0_26, %c0_27], %57 {strides = array<i32>} : memref<1x1x128xf32, #tpu.memory_space<vmem>>, vector<1x1x128xf32>,
    return
  }
  func.func @transform_0(%arg0: i32, %arg1: i32, %arg2: memref<2xi32, #tpu.memory_space<smem>>) -> (i32, i32, i32) {
    %c0_i32 = arith.constant 0 : i32
    %c0_i32_0 = arith.constant 0 : i32
    return %arg0, %arg1, %c0_i32 : i32, i32, i32
  }
  func.func @transform_1(%arg0: i32, %arg1: i32, %arg2: memref<2xi32, #tpu.memory_space<smem>>) -> (i32, i32, i32) {
    %c1_i32 = arith.constant 1 : i32
    %0 = arith.addi %arg1, %c1_i32 : i32
    %c4_i32 = arith.constant 4 : i32
    %1 = arith.muli %0, %c4_i32 : i32
    %c0_i32 = arith.constant 0 : i32
    %c0_i32_0 = arith.constant 0 : i32
    return %arg0, %1, %c0_i32 : i32, i32, i32
  }
  func.func @transform_2(%arg0: i32, %arg1: i32, %arg2: memref<2xi32, #tpu.memory_space<smem>>) -> (i32, i32) {
    %c0_i32 = arith.constant 0 : i32
    %c0_i32_0 = arith.constant 0 : i32
    %c0_i32_1 = arith.constant 0 : i32
    return %c0_i32, %c0_i32_0 : i32, i32
  }
  func.func @transform_3(%arg0: i32, %arg1: i32, %arg2: memref<2xi32, #tpu.memory_space<smem>>) -> (i32, i32) {
    %c0_i32 = arith.constant 0 : i32
    %c0_i32_0 = arith.constant 0 : i32
    %c0_i32_1 = arith.constant 0 : i32
    return %c0_i32, %c0_i32_0 : i32, i32
  }
  func.func @transform_4(%arg0: i32, %arg1: i32, %arg2: memref<2xi32, #tpu.memory_space<smem>>) -> (i32, i32, i32) {
    %c0_i32 = arith.constant 0 : i32
    %c0_i32_0 = arith.constant 0 : i32
    return %arg0, %arg1, %c0_i32 : i32, i32, i32
  }
  func.func @transform_5(%arg0: i32, %arg1: i32, %arg2: memref<2xi32, #tpu.memory_space<smem>>) -> (i32, i32, i32) {
    %c0_i32 = arith.constant 0 : i32
    %c0_i32_0 = arith.constant 0 : i32
    %c0_i32_1 = arith.constant 0 : i32
    return %arg0, %c0_i32, %c0_i32_0 : i32, i32, i32
  }
}

</mosaic_0001>

<bundles_post_ra>
// kernel: tpu_custom_call.1
= control target key start
LH: loop header
LB: loop body
LE: loop exit
PB: predicated region body
PF: predicated region fallthrough
CT: control target
= control target key end

     0   :  { %s3839_s0 = inlined_call_operand.hbm [shape: s32[2], index: 0, kind: input, shape index: {}]   ;;  %s3840_s1 = inlined_call_operand.hbm [shape: bf16[2,80,160], index: 1, kind: input, shape index: {}]   ;;  %s3841_s2 = inlined_call_operand.hbm [shape: bf16[2,80,160], index: 2, kind: input, shape index: {}]   ;;  %s3842_s3 = inlined_call_operand.hbm [shape: bf16[480,512], index: 3, kind: input, shape index: {}]   ;;  %s3843_s4 = inlined_call_operand.hbm [shape: bf16[256,128], index: 4, kind: input, shape index: {}]   ;;  %s3844_s5 = inlined_call_operand.hbm [shape: f32[2,64,128], index: 5, kind: output, shape index: {0}]   ;;  %s3845_s6 = inlined_call_operand.hbm [shape: f32[2,1,128], index: 6, kind: output, shape index: {1}]  }
   0x1   :  { %3852 = sst [smem:[#allocation25_spill]] %s3840_s1  ;;  %s2927_s23 = scalar_lea.hbm %s3839_s0, 16 }
   0x2   :  { %3853 = sst [smem:[#allocation26_spill]] %s3842_s3  ;;  %p2928_p0 = scmp.ne.s32.totalorder %s3839_s0, %s2927_s23 }
   0x3   :  { %3854 = sst [smem:[#allocation27_spill]] %s3843_s4  ;;  %p2931_p1 = scmp.lt.u32.totalorder %s2927_s23, %s3839_s0 }
   0x5   :  { %p2933_p2 = pnand %p2931_p1, %p2928_p0 }
   0x7   :  { %2936 = shalt.err (!%p2933_p2)  }
   0x8   :  { %s3184_s28 = smov [#allocation3]  }
   0x9   :  { %13 = dma.hbm_to_smem %s3839_s0, 16, %s3184_s28, [#allocation2] }
   0xa   :  { %3134 = dma.done.wait [#allocation2], 16 }
   0xb   :  { %3135 = vsyncadd [#allocation2], 4294967280 }
   0xc   :  { %15 = sfence }
   0xd   :  { %16 = vsyncpa [#allocation5], 0 }
   0xe   :  { %18 = vsyncpa [#allocation5 + $0x1], 0 }
   0xf   :  { %19 = vsyncpa [#allocation8], 0 }
  0x10   :  { %21 = vsyncpa [#allocation8 + $0x1], 0 }
  0x11   :  { %22 = vsyncpa [#allocation11], 0 }
  0x12   :  { %23 = vsyncpa [#allocation6], 0 }
  0x13   :  { %25 = vsyncpa [#allocation6 + $0x1], 0 }
  0x14   :  { %26 = vsyncpa [#allocation14], 0 }
  0x15   :  { %28 = vsyncpa [#allocation14 + $0x1], 0  ;;  %s3247_s7 = smov 0   ;;  %s3249_s8 = smov 0  }
  0x16   :  { %s3251_s9 = smov 0   ;;  %s3253_s10 = smov 0  }
  0x17   :  { %s3255_s0 = smov 0   ;;  %s3257_s11 = smov 0  }
  0x18 LB: > { %3855 = sst [smem:[#allocation22_spill]] %s3170_s9  ;;  %s3278_s12 = sadd.s32 4294967295, %s3182_s11   ;;  %s3182_s11 = sphi %s3257_s11, %s34_s11   ;;  %s3178_s0 = sphi %s3255_s0, %s3883_s0   ;;  %s3174_s10 = sphi %s3253_s10, %s3882_s10   ;;  %s3170_s9 = sphi %s3251_s9, %s3878_s9   ;;  %s3166_s8 = sphi %s3249_s8, %s3881_s8   ;;  %s3162_s7 = sphi %s3247_s7, %s3880_s7  }
  0x19   : > { %s2293_s13 = sadd.s32 4294967294, %s3182_s11   ;;  %p68_p3 = scmp.ne.s32.totalorder %s3166_s8, %s3162_s7 }
  0x1a   : > { %p3846_p4 = scmp.eq.s32.totalorder %s3278_s12, 0  ;;  %p174_p6 = scmp.eq.s32.totalorder %s2293_s13, 1 }
  0x1b   : > { %p2294_p8 = scmp.ge.s32.totalorder %s3182_s11, 1  ;;  %p207_p10 = scmp.lt.s32.totalorder %s3182_s11, 3 }
  0x1c   : > { %p3287_p7 = por %p3846_p4, %p68_p3  ;;  %p3292_p9 = por %p174_p6, %p68_p3 }
  0x1d   : > { %p3297_p11 = pnand %p2294_p8, %p207_p10  ;;  %s3185_s17 = smov [#allocation9]  }
  0x1e   : > { %s3856_s14 = scalar_select %p3287_p7, 1, 0 }
  0x1f   : > { %s3857_s15 = scalar_select %p3292_p9, 1, 0 }
  0x20   : > { %s219_s18 = sshll.u32 %s3185_s17, 4  ;;  %p2620_p12 = pneg %p3297_p11  ;;  %s3301_s18 = int_to_ptr.vmem [resolvable:$true] %s219_s18 }
  0x21   : > { %s3186_s20 = smov [#allocation10]   ;;  %s3860_s3 = sld [smem:[#allocation26_spill]] }
  0x22   : > { %p3308_p0 = pnand %p2620_p12, %p3846_p4  ;;  %s232_s21 = sshll.u32 %s3186_s20, 4  ;;  %s3312_s21 = int_to_ptr.vmem [resolvable:$true] %s232_s21 }
  0x24   : > { %p2939_p2 = pneg %p3308_p0 }
  0x27   : > { %s2937_s24 = scalar_lea.hbm %s3860_s3, 15360 }
  0x28   : > { %p2938_p1 = scmp.ne.s32.totalorder %s3860_s3, %s2937_s24  ;;  %p2944_p8 = scmp.lt.u32.totalorder %s2937_s24, %s3860_s3 }
  0x2a   : > { %p2940_p3 = pnand %p2939_p2, %p2938_p1 }
  0x2c   : > { %p2941_p6 = pneg %p2940_p3 }
  0x2e   : > { %p2946_p10 = pnand %p2944_p8, %p2941_p6 }
  0x30   : > { %2949 = shalt.err (!%p2946_p10)
}
  0x31   : > { %s2950_s29 = scalar_lea.vmem %s3301_s18, 15360  ;;  %p2958_p5 = scmp.lt.s32.totalorder %s3301_s18, %s3301_s18 }
  0x32   : > { %p2951_p12 = scmp.ne.s32.totalorder %s3301_s18, %s2950_s29  ;;  %p2959_p1 = scmp.lt.s32.totalorder %s2950_s29, %s2950_s29 }
  0x34   : > { %p2953_p13 = pnand %p2951_p12, %p2939_p2  ;;  %p2960_p3 = por %p2959_p1, %p2958_p5 }
  0x36   : > { %p2954_p4 = pneg %p2953_p13 }
  0x38   : > { %p2961_p9 = pnand %p2960_p3, %p2954_p4 }
  0x3a   : > { %2964 = shalt.err (!%p2961_p9)
}
  0x3b   : > { %s3187_s30 = smov 256   ;;  %s3188_s13 = smov 16  }
  0x3c   : > { %2623 = dma.hbm_to_vmem [thread:$0]  (!%p3308_p0), %s3860_s3, 15360, %s3301_s18, [#allocation8], %s3187_s30, %s3187_s30, %s3188_s13  }
  0x3d   : > { %s3861_s4 = sld [smem:[#allocation27_spill]] }
  0x43   : > { %s2965_s24 = scalar_lea.hbm %s3861_s4, 2048 }
  0x44   : > { %p2966_p5 = scmp.ne.s32.totalorder %s3861_s4, %s2965_s24  ;;  %p2972_p13 = scmp.lt.u32.totalorder %s2965_s24, %s3861_s4 }
  0x46   : > { %p2968_p4 = pnand %p2966_p5, %p2939_p2 }
  0x48   : > { %p2969_p9 = pneg %p2968_p4 }
  0x4a   : > { %p2974_p6 = pnand %p2972_p13, %p2969_p9 }
  0x4c   : > { %2977 = shalt.err (!%p2974_p6)
}
  0x4d   : > { %s2978_s18 = scalar_lea.vmem %s3312_s21, 2048  ;;  %p2986_p1 = scmp.lt.s32.totalorder %s3312_s21, %s3312_s21 }
  0x4e   : > { %p2979_p8 = scmp.ne.s32.totalorder %s3312_s21, %s2978_s18  ;;  %p2987_p3 = scmp.lt.s32.totalorder %s2978_s18, %s2978_s18 }
  0x50   : > { %p2981_p10 = pnand %p2979_p8, %p2939_p2  ;;  %p2988_p5 = por %p2987_p3, %p2986_p1 }
  0x52   : > { %p2982_p12 = pneg %p2981_p10 }
  0x54   : > { %p2989_p4 = pnand %p2988_p5, %p2982_p12 }
  0x56   : > { %2992 = shalt.err (!%p2989_p4)
}
  0x57   : > { %s3189_s29 = smov 64   ;;  %s3190_s30 = smov 4  }
  0x58   : > { %2626 = dma.hbm_to_vmem [thread:$0]  (!%p3308_p0), %s3861_s4, 2048, %s3312_s21, [#allocation11], %s3189_s29, %s3189_s29, %s3190_s30  }
  0x59   : > { %s46_s20 = sadd.s32 1, %s3178_s0  ;;  %s55_s22 = sadd.s32 1, %s3170_s9 }
  0x5a   : > { %p48_p2 = scmp.ge.s32.totalorder %s46_s20, 2  ;;  %p62_p9 = scmp.ne.s32.totalorder %s3170_s9, %s3166_s8 }
  0x5b   : > { %p63_p13 = scmp.eq.s32.totalorder %s3182_s11, 0  ;;  %p2643_p6 = scmp.lt.s32.totalorder %s3182_s11, 2 }
  0x5c   : > { %s3885_s20 = smov (%p48_p2, %s46_s20), 0  ;;  %p3863_p10 = scmp.eq.s32.totalorder %s3278_s12, 1 }
  0x5d   : > { %3862 = sst [smem:[#allocation23_spill]] %s3885_s20  ;;  %p64_p8 = por %p63_p13, %p62_p9 }
  0x5e   : > { %p3376_p12 = por %p3863_p10, %p62_p9  ;;  %s50_s23 = ssub.s32 %s3178_s0, %s3885_s20 }
  0x5f   : > { %s3383_s24 = sand.u32 1, %s3170_s9   ;;  %p53_p0 = scmp.eq.s32.totalorder %s50_s23, 0 }
  0x60   : > { %s3864_s19 = scalar_select %p3376_p12, 1, 0 }
  0x61   : > { %s2298_s21 = sshll.u32 %s3383_s24, 6  ;;  %s3847_s25 = smul.u32 1280, %s3178_s0 }
  0x62   : > { %s3388_s26 = scalar_select %p53_p0, %s3170_s9, %s55_s22  }
  0x63   : > { %s3866_s1 = sld [smem:[#allocation25_spill]]  ;;  %s250_s29 = scalar_lea.vmem [#allocation4], %s2298_s21 }
  0x64   : > { %3865 = sst [smem:[#allocation24_spill]] %s3388_s26  ;;  %s267_s30 = sshll.u32 %s250_s29, 4  ;;  %s3403_s30 = int_to_ptr.vmem [resolvable:$true] %s267_s30 }
  0x65   : > { %p3399_p1 = pnand %p2643_p6, %p64_p8  ;;  %s247_s17 = scalar_lea.sflag [#allocation5], %s3383_s24 }
  0x67   : > { %p2995_p5 = pneg %p3399_p1 }
  0x69   : > { %s3395_s18 = scalar_lea.hbm %s3866_s1, %s3847_s25  ;;  %s2998_s27 = scalar_lea.hbm %s3866_s1, 2560 }
  0x6a   : > { %s2993_s22 = scalar_lea.hbm %s3395_s18, 1024  ;;  %p2999_p9 = scmp.lt.u32.totalorder %s3395_s18, %s3866_s1 }
  0x6b   : > { %p2994_p3 = scmp.ne.s32.totalorder %s3395_s18, %s2993_s22  ;;  %p3000_p13 = scmp.lt.u32.totalorder %s2998_s27, %s2993_s22 }
  0x6c   : > { %p3002_p8 = scmp.lt.u32.totalorder %s2993_s22, %s3395_s18 }
  0x6d   : > { %p2996_p4 = pnand %p2995_p5, %p2994_p3  ;;  %p3001_p6 = por %p3000_p13, %p2999_p9 }
  0x6f   : > { %p2997_p2 = pneg %p2996_p4  ;;  %p3003_p10 = por %p3002_p8, %p3001_p6 }
  0x71   : > { %p3004_p0 = pnand %p3003_p10, %p2997_p2 }
  0x73   : > { %3007 = shalt.err (!%p3004_p0)
}
  0x74   : > { %s3008_s25 = scalar_lea.vmem %s3403_s30, 1024  ;;  %s3191_s23 = smov [#allocation4]  }
  0x75   : > { %p3009_p3 = scmp.ne.s32.totalorder %s3403_s30, %s3008_s25  ;;  %s3013_s21 = sshll.u32 %s3191_s23, 4  ;;  %s3014_s21 = int_to_ptr.vmem [resolvable:$false] %s3013_s21 }
  0x76   : > { %s3015_s28 = scalar_lea.vmem %s3014_s21, 2048  ;;  %p3016_p7 = scmp.lt.s32.totalorder %s3403_s30, %s3014_s21 }
  0x77   : > { %p3011_p4 = pnand %p3009_p3, %p2995_p5  ;;  %p3017_p9 = scmp.lt.s32.totalorder %s3015_s28, %s3008_s25 }
  0x79   : > { %p3012_p12 = pneg %p3011_p4  ;;  %p3018_p13 = por %p3017_p9, %p3016_p7 }
  0x7b   : > { %p3019_p6 = pnand %p3018_p13, %p3012_p12 }
  0x7d   : > { %3022 = shalt.err (!%p3019_p6)
}
  0x7e   : > { %s3192_s22 = smov 128   ;;  %s3193_s27 = smov 8  }
  0x7f   : > { %2630 = dma.hbm_to_vmem [thread:$0]  (!%p3399_p1), %s3395_s18, 1024, %s3403_s30, %s247_s17, %s3192_s22, %s3192_s22, %s3193_s27  }
  0x80   : > { %s277_s25 = sand.u32 1, %s3182_s11   ;;  %s2300_s29 = sshll.u32 %s3383_s24, 4 }
  0x81   : > { %s3868_s23 = smul.u32 1280, %s3178_s0  ;;  %s281_s3 = scalar_lea.vmem [#allocation7], %s2300_s29 }
  0x82   : > { %s293_s4 = sshll.u32 %s281_s3, 4  ;;  %s3447_s26 = scalar_lea.sflag [#allocation8], %s277_s25  ;;  %s3445_s4 = int_to_ptr.vmem [resolvable:$true] %s293_s4 }
  0x83   : > { %s2188_s1 = scalar_lea.hbm %s3841_s2, %s3868_s23  ;;  %s3028_s30 = scalar_lea.hbm %s3841_s2, 2560 }
  0x84   : > { %s3443_s20 = scalar_lea.hbm %s2188_s1, 1024  ;;  %s3053_s9 = scalar_lea.hbm %s2188_s1, 1280 }
  0x85   : > { %p3024_p7 = scmp.ne.s32.totalorder %s3443_s20, %s3053_s9  ;;  %p3029_p8 = scmp.lt.u32.totalorder %s3443_s20, %s3841_s2 }
  0x86   : > { %p3030_p10 = scmp.lt.u32.totalorder %s3028_s30, %s3053_s9  ;;  %p3032_p3 = scmp.lt.u32.totalorder %s3053_s9, %s3443_s20 }
  0x87   : > { %p3026_p12 = pnand %p3024_p7, %p2995_p5 }
  0x88   : > { %p3031_p0 = por %p3030_p10, %p3029_p8 }
  0x89   : > { %p3027_p2 = pneg %p3026_p12 }
  0x8a   : > { %p3033_p4 = por %p3032_p3, %p3031_p0 }
  0x8c   : > { %p3034_p9 = pnand %p3033_p4, %p3027_p2 }
  0x8e   : > { %3037 = shalt.err (!%p3034_p9)
}
  0x8f   : > { %s3038_s1 = scalar_lea.vmem %s3445_s4, 256  ;;  %s3194_s25 = smov [#allocation7]  }
  0x90   : > { %p3039_p13 = scmp.ne.s32.totalorder %s3445_s4, %s3038_s1  ;;  %s3043_s29 = sshll.u32 %s3194_s25, 4  ;;  %s3044_s29 = int_to_ptr.vmem [resolvable:$false] %s3043_s29 }
  0x91   : > { %s3045_s23 = scalar_lea.vmem %s3044_s29, 512  ;;  %p3046_p12 = scmp.lt.s32.totalorder %s3445_s4, %s3044_s29 }
  0x92   : > { %p3041_p6 = pnand %p3039_p13, %p2995_p5  ;;  %p3047_p8 = scmp.lt.s32.totalorder %s3045_s23, %s3038_s1 }
  0x94   : > { %p3042_p7 = pneg %p3041_p6  ;;  %p3048_p10 = por %p3047_p8, %p3046_p12 }
  0x96   : > { %p3049_p0 = pnand %p3048_p10, %p3042_p7 }
  0x98   : > { %3052 = shalt.err (!%p3049_p0)
}
  0x99   : > { %2633 = dma.hbm_to_vmem [thread:$0]  (!%p3399_p1), %s3443_s20, 256, %s3445_s4, %s3447_s26, %s3192_s22, %s3192_s22, %s3193_s27  }
  0x9a   : > { %305 = sbr.rel (%p3297_p11) target bundleno = 815 (0x32f), region = 36  ;;  %s3478_s9 = sand.u32 (!%p3297_p11), 1, %s3166_s8  }
  0x9b   : > { %s2303_s21 = sshll.u32 (!%p3297_p11), %s3478_s9, 6  ;;  %s308_s28 = scalar_lea.sflag (!%p3297_p11), [#allocation5], %s3478_s9 }
  0x9c   : > { %s3484_s13 = scalar_lea.vmem (!%p3297_p11), [#allocation4], %s2303_s21  ;;  %p3869_p5 = scmp.ne.s32.totalorder (!%p3297_p11), %s3856_s14, 0 }
  0xa1   : > { %3137 = dma.done.wait (%p3869_p5), %s308_s28, 1024  }
  0xa2   : > { %3139 = vsyncadd (%p3869_p5), %s308_s28, 4294966272  ;;  %s316_s4 = sand.u32 1, %s3278_s12   ;;  %s2304_s16 = sshll.u32 %s3478_s9, 4 }
  0xa3   : > { %s317_s20 = scalar_lea.sflag [#allocation8], %s316_s4  ;;  %s3492_s26 = scalar_lea.vmem [#allocation7], %s2304_s16 }
  0xa4   : > { %3141 = dma.done.wait (%p3869_p5), %s317_s20, 256  }
  0xa5   : > { %3143 = vsyncadd (%p3869_p5), %s317_s20, 4294967040  ;;  %p3870_p11 = scmp.eq.s32.totalorder %s3278_s12, 0 }
  0xa7   : > { %3145 = dma.done.wait (%p3870_p11), [#allocation8], 15360   ;;  %p3871_p1 = pmov %p3870_p11 }
  0xa9   : > { %3147 = vsyncadd (%p3871_p1), [#allocation8], 4294951936  ;;  %p3872_p2 = pmov %p3871_p1 }
  0xaa   : > { %p3873_p3 = pmov %p3871_p1 }
  0xab   : > { %3149 = dma.done.wait (%p3872_p2), [#allocation11], 2048  }
  0xac   : > { %3151 = vsyncadd (%p3873_p3), [#allocation11], 4294965248  ;;  %v2707_v0 = vld [vmem:[#allocation9 + $0x144] ss:$16 sps:$4 sm:$0xff]   ;;  %v2709_v1 = vld [vmem:[#allocation9 + $0x14c] ss:$16 sps:$4 sm:$0xff]   ;;  %v461_v23 = vlaneseq }
  0xad   : > { %741 = vmatprep.subr.bf16.mxu0 %v2707_v0  ;;  %v2711_v2 = vld [vmem:[#allocation9 + $0x140] ss:$16 sps:$4 sm:$0xff]   ;;  %v2712_v3 = vld [vmem:[#allocation9 + $0x148] ss:$16 sps:$4 sm:$0xff]   ;;  %814 = vmatprep.subr.bf16.mxu1 %v2709_v1  ;;  %v2713_v4 = vld [vmem:[#allocation9 + $0x164] ss:$16 sps:$4 sm:$0xff]  }
  0xae   : > { %742 = vmatpush1.bf16.msra.mxu0 %v2711_v2  ;;  %815 = vmatpush1.bf16.msra.mxu1 %v2712_v3  ;;  %v2715_v5 = vld [vmem:[#allocation9 + $0x16c] ss:$16 sps:$4 sm:$0xff]   ;;  %v2717_v6 = vld [vmem:[#allocation9 + $0x160] ss:$16 sps:$4 sm:$0xff]   ;;  %v2718_v7 = vld [vmem:[#allocation9 + $0x168] ss:$16 sps:$4 sm:$0xff]  }
  0xaf   : > { %743 = vmatprep.subr.bf16.mxu0 %v2713_v4  ;;  %816 = vmatprep.subr.bf16.mxu1 %v2715_v5  ;;  %v2719_v8 = vld [vmem:[#allocation9 + $0x184] ss:$16 sps:$4 sm:$0xff]   ;;  %v2721_v9 = vld [vmem:[#allocation9 + $0x18c] ss:$16 sps:$4 sm:$0xff]   ;;  %v2723_v10 = vld [vmem:[#allocation9 + $0x180] ss:$16 sps:$4 sm:$0xff]  }
  0xb0   : > { %v2724_v11 = vld [vmem:[#allocation9 + $0x188] ss:$16 sps:$4 sm:$0xff]   ;;  %v2725_v12 = vld [vmem:[#allocation9 + $0x1a4] ss:$16 sps:$4 sm:$0xff]   ;;  %v2727_v13 = vld [vmem:[#allocation9 + $0x1ac] ss:$16 sps:$4 sm:$0xff]  }
  0xb1   : > { %v2729_v14 = vld [vmem:[#allocation9 + $0x1a0] ss:$16 sps:$4 sm:$0xff]   ;;  %v2730_v15 = vld [vmem:[#allocation9 + $0x1a8] ss:$16 sps:$4 sm:$0xff]   ;;  %v2731_v16 = vld [vmem:[#allocation9 + $0x1c4] ss:$16 sps:$4 sm:$0xff]  }
  0xb2   : > { %744 = vmatpush1.bf16.msra.mxu0 %v2717_v6  ;;  %817 = vmatpush1.bf16.msra.mxu1 %v2718_v7  ;;  %v2733_v17 = vld [vmem:[#allocation9 + $0x1cc] ss:$16 sps:$4 sm:$0xff]   ;;  %v2735_v18 = vld [vmem:[#allocation9 + $0x1c0] ss:$16 sps:$4 sm:$0xff]   ;;  %v2736_v19 = vld [vmem:[#allocation9 + $0x1c8] ss:$16 sps:$4 sm:$0xff]  }
  0xb3   : > { %745 = vmatprep.subr.bf16.mxu0 %v2719_v8  ;;  %818 = vmatprep.subr.bf16.mxu1 %v2721_v9  ;;  %v2737_v20 = vld [vmem:[#allocation9 + $0x1e4] ss:$16 sps:$4 sm:$0xff]   ;;  %v2739_v21 = vld [vmem:[#allocation9 + $0x1ec] ss:$16 sps:$4 sm:$0xff]   ;;  %v2741_v22 = vld [vmem:[#allocation9 + $0x1e0] ss:$16 sps:$4 sm:$0xff]  }
  0xb4   : > { %v2742_v24 = vld [vmem:[#allocation9 + $0x1e8] ss:$16 sps:$4 sm:$0xff]   ;;  %v2743_v25 = vld [vmem:[#allocation9 + $0x204] ss:$16 sps:$4 sm:$0xff]   ;;  %v2745_v26 = vld [vmem:[#allocation9 + $0x20c] ss:$16 sps:$4 sm:$0xff]  }
  0xb5   : > { %v2747_v27 = vld [vmem:[#allocation9 + $0x200] ss:$16 sps:$4 sm:$0xff]   ;;  %v2748_v28 = vld [vmem:[#allocation9 + $0x208] ss:$16 sps:$4 sm:$0xff]   ;;  %v3506_v29 = vshrl.u32 %v461_v23, 7  ;;  %vm728_vm0 = vcmask 261120  }
  0xb6   : > { %746 = vmatpush1.bf16.msra.mxu0 %v2723_v10  ;;  %819 = vmatpush1.bf16.msra.mxu1 %v2724_v11  ;;  %v2749_v30 = vld [vmem:[#allocation9 + $0x224] ss:$16 sps:$4 sm:$0xff]   ;;  %v2751_v31 = vld [vmem:[#allocation9 + $0x22c] ss:$16 sps:$4 sm:$0xff]   ;;  %v2753_v32 = vld [vmem:[#allocation9 + $0x220] ss:$16 sps:$4 sm:$0xff]  }
  0xb7   : > { %747 = vmatprep.subr.bf16.mxu0 %v2725_v12  ;;  %820 = vmatprep.subr.bf16.mxu1 %v2727_v13  ;;  %v3509_v33 = vld [vmem:[%s3484_s13] sm:$0xff]  ;;  %v3512_v34 = vld [vmem:[%s3484_s13 + $0x8] sm:$0xff]  ;;  %v3515_v35 = vld [vmem:[%s3484_s13 + $0x10] sm:$0xff]  ;;  %vm463_vm1 = vcmp.lt.s32.totalorder %v3506_v29, 7  ;;  %vm1299_vm2 = vcmp.lt.s32.totalorder %v3506_v29, 6  ;;  %s3716_s12 = scalar_lea.vmem [#allocation13], %s3478_s9 }
  0xb8   : > { %v385_v36 = vunpack.c.h.bf16 %v3509_v33  ;;  %v384_v37 = vunpack.c.l.bf16 %v3509_v33  ;;  %v2754_v38 = vld [vmem:[#allocation9 + $0x228] ss:$16 sps:$4 sm:$0xff]   ;;  %v2755_v39 = vld [vmem:[#allocation9 + $0x244] ss:$16 sps:$4 sm:$0xff]   ;;  %v387_v40 = vunpack.c.h.bf16 %v3512_v34  ;;  %v389_v41 = vunpack.c.h.bf16 %v3515_v35  ;;  %v2757_v44 = vld [vmem:[#allocation9 + $0x24c] ss:$16 sps:$4 sm:$0xff]  }
  0xb9   : > { %v386_v42 = vunpack.c.l.bf16 %v3512_v34  ;;  %v388_v43 = vunpack.c.l.bf16 %v3515_v35  ;;  %v2759_v47 = vld [vmem:[#allocation9 + $0x240] ss:$16 sps:$4 sm:$0xff]   ;;  %v2760_v56 = vld [vmem:[#allocation9 + $0x248] ss:$16 sps:$4 sm:$0xff]   ;;  %v2761_v57 = vld [vmem:[#allocation9 + $0x264] ss:$16 sps:$4 sm:$0xff]  }
  0xba   : > { %748 = vmatpush1.bf16.msra.mxu0 %v2729_v14  ;;  %821 = vmatpush1.bf16.msra.mxu1 %v2730_v15  ;;  %v444_v45 = vrot.slane %v385_v36, 1  ;;  %v1282_v46 = vrot.slane %v385_v36, 2  ;;  %v446_v48 = vrot.slane %v387_v40, 1  ;;  %v3525_v49 = vrot.slane %v389_v41, 1  ;;  %v2763_v62 = vld [vmem:[#allocation9 + $0x26c] ss:$16 sps:$4 sm:$0xff]  }
  0xbb   : > { %749 = vmatprep.subr.bf16.mxu0 %v2731_v16  ;;  %822 = vmatprep.subr.bf16.mxu1 %v2733_v17  ;;  %v1284_v50 = vrot.slane %v387_v40, 2  ;;  %v3527_v51 = vrot.slane %v389_v41, 2  ;;  %v443_v52 = vrot.slane %v384_v37, 1  ;;  %v445_v53 = vrot.slane %v386_v42, 1  ;;  %v2765_v3 = vld [vmem:[#allocation9 + $0x260] ss:$16 sps:$4 sm:$0xff]  }
  0xbc   : > { %v3529_v54 = vrot.slane %v388_v43, 1  ;;  %v1281_v55 = vrot.slane %v384_v37, 2  ;;  %v477_v58 = vsel %vm463_vm1, %v446_v48, %v3525_v49  ;;  %v479_v59 = vsel %vm463_vm1, %v444_v45, %v446_v48  ;;  %v2766_v6 = vld [vmem:[#allocation9 + $0x268] ss:$16 sps:$4 sm:$0xff]   ;;  %v2769_v7 = vld [vmem:[#allocation9 + $0x4] ss:$16 sps:$4 sm:$0xff]  }
  0xbd   : > { %v1283_v60 = vrot.slane %v386_v42, 2  ;;  %v3536_v61 = vrot.slane %v388_v43, 2  ;;  %v481_v63 = vpack.c.bf16 %v477_v58, %v479_v59  ;;  %v1313_v0 = vsel %vm1299_vm2, %v1284_v50, %v3527_v51  ;;  %v2772_v11 = vld [vmem:[#allocation9 + $0xc] ss:$16 sps:$4 sm:$0xff]   ;;  %v2767_v12 = vld [vmem:[#allocation9] ss:$16 sps:$4 sm:$0xff]  }
  0xbe   : > { %750 = vmatpush1.bf16.msra.mxu0 %v2735_v18  ;;  %823 = vmatpush1.bf16.msra.mxu1 %v2736_v19  ;;  %v1315_v1 = vsel %vm1299_vm2, %v1282_v46, %v1284_v50  ;;  %v476_v8 = vsel %vm463_vm1, %v445_v53, %v3529_v54  ;;  %v478_v9 = vsel %vm463_vm1, %v443_v52, %v445_v53  ;;  %v2770_v13 = vld [vmem:[#allocation9 + $0x8] ss:$16 sps:$4 sm:$0xff]   ;;  %v3563_v16 = vld [vmem:[%s3484_s13 + $0x20] sm:$0xff]  ;;  %v2784_v36 = vld [vmem:[#allocation9 + $0x4c] ss:$16 sps:$4 sm:$0xff]   ;;  %s375_s14 = sld [smem:[#allocation3 + %s3174_s10]] }
  0xbf   : > { %751 = vmatprep.subr.bf16.mxu0 %v2737_v20  ;;  %824 = vmatprep.subr.bf16.mxu1 %v2739_v21  ;;  %v1312_v2 = vsel %vm1299_vm2, %v1283_v60, %v3536_v61  ;;  %v3548_v4 = vpack.c.bf16 %v1313_v0, %v1315_v1  ;;  %v1314_v5 = vsel %vm1299_vm2, %v1281_v55, %v1283_v60  ;;  %v3560_v15 = vld [vmem:[%s3484_s13 + $0x18] sm:$0xff]  ;;  %v2775_v19 = vld [vmem:[#allocation9 + $0x24] ss:$16 sps:$4 sm:$0xff]   ;;  %v393_v21 = vunpack.c.h.bf16 %v3563_v16  ;;  %v3580_v40 = vld [vmem:[%s3484_s13 + $0x28] sm:$0xff]  ;;  %s3728_s22 = scalar_lea.vmem [#allocation12], %s2303_s21  ;;  %s2482_s27 = sshll.u32 %s3174_s10, 10 }
  0xc0   : > { %2348 = vmatprep.mubr.msk.bf16.mxu0 %vm728_vm0, %v481_v63  ;;  %2352 = vmatprep.mubr.msk.bf16.mxu1 %vm728_vm0, %v481_v63  ;;  %v3557_v10 = vpack.c.bf16 %v1312_v2, %v1314_v5  ;;  %v480_v14 = vpack.c.bf16 %v476_v8, %v478_v9  ;;  %v391_v17 = vunpack.c.h.bf16 %v3560_v15  ;;  %v390_v18 = vunpack.c.l.bf16 %v3560_v15  ;;  %v2778_v20 = vld [vmem:[#allocation9 + $0x2c] ss:$16 sps:$4 sm:$0xff]   ;;  %v3585_v43 = vld [vmem:[%s3484_s13 + $0x30] sm:$0xff]  ;;  %v2788_v0 = vld [vmem:[#allocation9 + $0x68] ss:$16 sps:$4 sm:$0xff]   ;;  %s2118_s24 = sshll.u32 %s3728_s22, 4  ;;  %s3753_s3 = scalar_lea.hbm %s3844_s5, %s2482_s27  ;;  %s3755_s24 = int_to_ptr.vmem [resolvable:$true] %s2118_s24 }
  0xc1   : > { %v3582_v41 = vrot.slane %v393_v21, 2  ;;  %v394_v45 = vunpack.c.l.bf16 %v3580_v40  ;;  %v2779_v46 = vld [vmem:[#allocation9 + $0x40] ss:$16 sps:$4 sm:$0xff]   ;;  %v396_v50 = vunpack.c.l.bf16 %v3585_v43  ;;  %v2787_v52 = vld [vmem:[#allocation9 + $0x64] ss:$16 sps:$4 sm:$0xff]   ;;  %v3614_v5 = vld [vmem:[%s3484_s13 + $0x38] sm:$0xff] }
  0xc2   : > { %752 = vmatpush1.bf16.msra.mxu0 %v2741_v22  ;;  %825 = vmatpush1.bf16.msra.mxu1 %v2742_v24  ;;  %v392_v22 = vunpack.c.l.bf16 %v3563_v16  ;;  %v450_v23 = vrot.slane %v391_v17, 1  ;;  %v452_v24 = vrot.slane %v393_v21, 1  ;;  %v2790_v53 = vld [vmem:[#allocation9 + $0x6c] ss:$16 sps:$4 sm:$0xff]   ;;  %v2785_v63 = vld [vmem:[#allocation9 + $0x60] ss:$16 sps:$4 sm:$0xff]   ;;  %v399_v8 = vunpack.c.h.bf16 %v3614_v5 }
  0xc3   : > { %753 = vmatprep.subr.bf16.mxu0 %v2743_v25  ;;  %826 = vmatprep.subr.bf16.mxu1 %v2745_v26  ;;  %v449_v25 = vrot.slane %v390_v18, 1  ;;  %v453_v58 = vrot.slane %v394_v45, 1  ;;  %v455_v59 = vrot.slane %v396_v50, 1  ;;  %v400_v9 = vld [vmem:[%s3492_s26] sm:$0xff]  ;;  %s2099_s17 = scalar_lea.sflag [#allocation6], %s3478_s9  ;;  %s3054_s1 = scalar_lea.vmem %s3755_s24, 1024 }
  0xc4   : > { %v451_v26 = vrot.slane %v392_v22, 1  ;;  %v473_v37 = vsel %vm463_vm1, %v450_v23, %v452_v24  ;;  %p3055_p4 = scmp.ne.s32.totalorder %s3755_s24, %s3054_s1  ;;  %p3874_p9 = scmp.ne.s32.totalorder %s3864_s19, 0 }
  0xc5   : > { %v468_v2 = vsel %vm463_vm1, %v453_v58, %v455_v59  ;;  %s3196_s25 = smov [#allocation12]  }
  0xc6   : > { %754 = vmatpush1.bf16.msra.mxu0 %v2747_v27  ;;  %827 = vmatpush1.bf16.msra.mxu1 %v2748_v28  ;;  %v2773_v27 = vld [vmem:[#allocation9 + $0x20] ss:$16 sps:$4 sm:$0xff]   ;;  %v2776_v28 = vld [vmem:[#allocation9 + $0x28] ss:$16 sps:$4 sm:$0xff]   ;;  %p3056_p13 = pnand %p3055_p4, %p3874_p9  ;;  %s3058_s29 = sshll.u32 %s3196_s25, 4  ;;  %s3059_s29 = int_to_ptr.vmem [resolvable:$false] %s3058_s29 }
  0xc7   : > { %755 = vmatprep.subr.bf16.mxu0 %v2749_v30  ;;  %828 = vmatprep.subr.bf16.mxu1 %v2751_v31  ;;  %v475_v30 = vsel %vm463_vm1, %v3525_v49, %v450_v23  ;;  %v1288_v31 = vrot.slane %v391_v17, 2  ;;  %v397_v49 = vunpack.c.h.bf16 %v3585_v43  ;;  %v401_v17 = vunpack.c.l.bf16 %v400_v9  ;;  %s3060_s23 = scalar_lea.vmem %s3059_s29, 2048  ;;  %p3061_p7 = scmp.lt.s32.totalorder %s3755_s24, %s3059_s29 }
  0xc8   : > { %v483_v42 = vpack.c.bf16 %v473_v37, %v475_v30  ;;  %p3057_p6 = pneg %p3056_p13  ;;  %p3062_p12 = scmp.lt.s32.totalorder %s3060_s23, %s3054_s1 }
  0xc9   : > { %v1309_v55 = vsel %vm1299_vm2, %v1288_v31, %v3582_v41 }
  0xca   : > { %756 = vmatpush1.bf16.msra.mxu0 %v2753_v32  ;;  %829 = vmatpush1.bf16.msra.mxu1 %v2754_v38  ;;  %v2781_v32 = vld [vmem:[#allocation9 + $0x44] ss:$16 sps:$4 sm:$0xff]   ;;  %v472_v38 = vsel %vm463_vm1, %v449_v25, %v451_v26  ;;  %p3063_p8 = por %p3062_p12, %p3061_p7 }
  0xcb   : > { %757 = vmatprep.subr.bf16.mxu0 %v2755_v39  ;;  %830 = vmatprep.subr.bf16.mxu1 %v2757_v44  ;;  %v474_v39 = vsel %vm463_vm1, %v3529_v54, %v449_v25  ;;  %v395_v44 = vunpack.c.h.bf16 %v3580_v40 }
  0xcc   : > { %v482_v48 = vpack.c.bf16 %v472_v38, %v474_v39  ;;  %p3064_p10 = pnand %p3063_p8, %p3057_p6 }
  0xcd   : > { %v454_v54 = vrot.slane %v395_v44, 1  ;;  %v1292_v30 = vrot.slane %v395_v44, 2  ;;  %v2797_v44 = vld [vmem:[#allocation9 + $0xa0] ss:$16 sps:$4 sm:$0xff]  }
  0xce   : > { %758 = vmatpush1.bf16.msra.mxu0 %v2759_v47  ;;  %831 = vmatpush1.bf16.msra.mxu1 %v2760_v56  ;;  %v2782_v47 = vld [vmem:[#allocation9 + $0x48] ss:$16 sps:$4 sm:$0xff]   ;;  %v1311_v56 = vsel %vm1299_vm2, %v3527_v51, %v1288_v31  ;;  %v2799_v31 = vld [vmem:[#allocation9 + $0xa4] ss:$16 sps:$4 sm:$0xff]  }
  0xcf   : > { %759 = vmatprep.subr.bf16.mxu0 %v2761_v57  ;;  %832 = vmatprep.subr.bf16.mxu1 %v2763_v62  ;;  %v456_v57 = vrot.slane %v397_v49, 1  ;;  %v3601_v60 = vpack.c.bf16 %v1309_v55, %v1311_v56  ;;  %v471_v51 = vsel %vm463_vm1, %v452_v24, %v454_v54  ;;  %v1287_v62 = vrot.slane %v390_v18, 2  ;;  %v2805_v55 = vld [vmem:[#allocation9 + $0xc4] ss:$16 sps:$4 sm:$0xff]   ;;  %v2808_v56 = vld [vmem:[#allocation9 + $0xcc] ss:$16 sps:$4 sm:$0xff]  }
  0xd0   : > { %v459_v24 = vrot.slane %v401_v17, 1  ;;  %v1307_v39 = vsel %vm1299_vm2, %v3582_v41, %v1292_v30 }
  0xd1   : > { %v469_v1 = vsel %vm463_vm1, %v454_v54, %v456_v57  ;;  %v1310_v21 = vsel %vm1299_vm2, %v3536_v61, %v1287_v62 }
  0xd2   : > { %760 = vmatpush1.bf16.msra.mxu0 %v2765_v3  ;;  %833 = vmatpush1.bf16.msra.mxu1 %v2766_v6  ;;  %v470_v3 = vsel %vm463_vm1, %v451_v26, %v453_v58  ;;  %v1289_v6 = vrot.slane %v392_v22, 2  ;;  %v2791_v26 = vld [vmem:[#allocation9 + $0x80] ss:$16 sps:$4 sm:$0xff]   ;;  %v1297_v58 = vrot.slane %v401_v17, 2 }
  0xd3   : > { %1135 = vmatprep.subr.bf16.mxu0 %v2769_v7  ;;  %1208 = vmatprep.subr.bf16.mxu1 %v2772_v11  ;;  %v485_v7 = vpack.c.bf16 %v469_v1, %v471_v51  ;;  %v398_v11 = vunpack.c.l.bf16 %v3614_v5  ;;  %v484_v18 = vpack.c.bf16 %v468_v2, %v470_v3  ;;  %v2806_v3 = vld [vmem:[#allocation9 + $0xc8] ss:$16 sps:$4 sm:$0xff]   ;;  %v2815_v17 = vld [vmem:[#allocation9 + $0x100] ss:$16 sps:$4 sm:$0xff]  }
  0xd5   : > { %774 = vmatmul.mubr.bf16.vlgmr.msra.gmra.mrb[0].mxu0 %v480_v14  ;;  %847 = vmatmul.mubr.bf16.vlgmr.msra.gmra.mrb[0].mxu1 %v480_v14  ;;  %v402_v14 = vunpack.c.h.bf16 %v400_v9  ;;  %v457_v23 = vrot.slane %v398_v11, 1  ;;  %v1295_v54 = vrot.slane %v398_v11, 2  ;;  %v2357_v9 = vcombine.high %v3509_v33, %v3512_v34  ;;  %v2809_v11 = vld [vmem:[#allocation9 + $0xe0] ss:$16 sps:$4 sm:$0xff]  }
  0xd6   : > { %1136 = vmatpush1.bf16.msra.mxu0 %v2767_v12  ;;  %1209 = vmatpush1.bf16.msra.mxu1 %v2770_v13  ;;  %v2793_v12 = vld [vmem:[#allocation9 + $0x84] ss:$16 sps:$4 sm:$0xff]   ;;  %v2796_v13 = vld [vmem:[#allocation9 + $0x8c] ss:$16 sps:$4 sm:$0xff]  }
  0xd7   : > { %1137 = vmatprep.subr.bf16.mxu0 %v2775_v19  ;;  %1210 = vmatprep.subr.bf16.mxu1 %v2778_v20  ;;  %v458_v19 = vrot.slane %v399_v8, 1  ;;  %v1308_v20 = vsel %vm1299_vm2, %v1287_v62, %v1289_v6  ;;  %v460_v22 = vrot.slane %v402_v14, 1  ;;  %v464_v38 = vsel %vm463_vm1, %v457_v23, %v459_v24  ;;  %v2833_v24 = vld [vmem:[#allocation9 + $0x28c] ss:$16 sps:$4 sm:$0xff]  }
  0xd8   : > { %2349 = vmatprep.mubr.msk.bf16.mxu0 %vm728_vm0, %v483_v42  ;;  %2353 = vmatprep.mubr.msk.bf16.mxu1 %vm728_vm0, %v483_v42  ;;  %v3626_v25 = vpack.c.bf16 %v1308_v20, %v1310_v21  ;;  %v1291_v42 = vrot.slane %v394_v45, 2  ;;  %v1300_v2 = vsel %vm1299_vm2, %v1295_v54, %v1297_v58  ;;  %v2826_v20 = vld [vmem:[#allocation9 + $0x12c] ss:$16 sps:$4 sm:$0xff]   ;;  %v2821_v21 = vld [vmem:[#allocation9 + $0x120] ss:$16 sps:$4 sm:$0xff]  }
  0xd9   : > { %v465_v61 = vsel %vm463_vm1, %v458_v19, %v460_v22  ;;  %v2824_v22 = vld [vmem:[#allocation9 + $0x128] ss:$16 sps:$4 sm:$0xff]   ;;  %v2874_v58 = vld [vmem:[#allocation9 + $0x34c] ss:$16 sps:$4 sm:$0xff]  }
  0xda   : > { %1138 = vmatpush1.bf16.msra.mxu0 %v2773_v27  ;;  %1211 = vmatpush1.bf16.msra.mxu1 %v2776_v28  ;;  %v2794_v27 = vld [vmem:[#allocation9 + $0x88] ss:$16 sps:$4 sm:$0xff]   ;;  %v467_v28 = vsel %vm463_vm1, %v456_v57, %v458_v19  ;;  %v1306_v45 = vsel %vm1299_vm2, %v1289_v6, %v1291_v42  ;;  %v2823_v19 = vld [vmem:[#allocation9 + $0x124] ss:$16 sps:$4 sm:$0xff]  }
  0xdb   : > { %1139 = vmatprep.subr.bf16.mxu0 %v2781_v32  ;;  %1212 = vmatprep.subr.bf16.mxu1 %v2784_v36  ;;  %v2802_v32 = vld [vmem:[#allocation9 + $0xac] ss:$16 sps:$4 sm:$0xff]   ;;  %v1294_v36 = vrot.slane %v397_v49, 2  ;;  %v487_v37 = vpack.c.bf16 %v465_v61, %v467_v28  ;;  %v1296_v49 = vrot.slane %v399_v8, 2  ;;  %v2831_v28 = vld [vmem:[#allocation9 + $0x288] ss:$16 sps:$4 sm:$0xff]   ;;  %v2359_v61 = vcombine.high %v3515_v35, %v3560_v15 }
  0xdc   : > { %v2814_v8 = vld [vmem:[#allocation9 + $0xec] ss:$16 sps:$4 sm:$0xff]  }
  0xdd   : > { %784 = vmatmul.mubr.bf16.gmra.mrb[4].mxu0 %v482_v48  ;;  %857 = vmatmul.mubr.bf16.gmra.mrb[4].mxu1 %v482_v48  ;;  %v1293_v48 = vrot.slane %v396_v50, 2  ;;  %v1303_v50 = vsel %vm1299_vm2, %v1294_v36, %v1296_v49 }
  0xde   : > { %1140 = vmatpush1.bf16.msra.mxu0 %v2779_v46  ;;  %1213 = vmatpush1.bf16.msra.mxu1 %v2782_v47  ;;  %v466_v46 = vsel %vm463_vm1, %v455_v59, %v457_v23  ;;  %v1305_v47 = vsel %vm1299_vm2, %v1292_v30, %v1294_v36  ;;  %v2830_v23 = vld [vmem:[#allocation9 + $0x284] ss:$16 sps:$4 sm:$0xff]   ;;  %v2838_v36 = vld [vmem:[#allocation9 + $0x2a8] ss:$16 sps:$4 sm:$0xff]  }
  0xdf   : > { %1141 = vmatprep.subr.bf16.mxu0 %v2787_v52  ;;  %1214 = vmatprep.subr.bf16.mxu1 %v2790_v53  ;;  %v2800_v52 = vld [vmem:[#allocation9 + $0xa8] ss:$16 sps:$4 sm:$0xff]   ;;  %v3645_v41 = vpack.c.bf16 %v1305_v47, %v1307_v39  ;;  %v1298_v53 = vrot.slane %v402_v14, 2  ;;  %v1304_v57 = vsel %vm1299_vm2, %v1291_v42, %v1293_v48  ;;  %v1302_v62 = vsel %vm1299_vm2, %v1293_v48, %v1295_v54  ;;  %v2820_v14 = vld [vmem:[#allocation9 + $0x10c] ss:$16 sps:$4 sm:$0xff]  }
  0xe0   : > { %2350 = vmatprep.mubr.msk.bf16.mxu0 %vm728_vm0, %v485_v7  ;;  %2354 = vmatprep.mubr.msk.bf16.mxu1 %vm728_vm0, %v485_v7  ;;  %v3655_v59 = vpack.c.bf16 %v1304_v57, %v1306_v45  ;;  %v3665_v6 = vpack.c.bf16 %v1300_v2, %v1302_v62  ;;  %v2811_v7 = vld [vmem:[#allocation9 + $0xe4] ss:$16 sps:$4 sm:$0xff]   ;;  %v2358_v39 = vcombine.low %v3515_v35, %v3560_v15  ;;  %v2850_v48 = vld [vmem:[#allocation9 + $0x2e8] ss:$16 sps:$4 sm:$0xff]   ;;  %v2855_v35 = vld [vmem:[#allocation9 + $0x300] ss:$16 sps:$4 sm:$0xff]  }
  0xe1   : > { %v1301_v51 = vsel %vm1299_vm2, %v1296_v49, %v1298_v53  ;;  %v2837_v30 = vld [vmem:[#allocation9 + $0x2a4] ss:$16 sps:$4 sm:$0xff]   ;;  %v2361_v47 = vcombine.high %v3563_v16, %v3580_v40  ;;  %v2858_v15 = vld [vmem:[#allocation9 + $0x308] ss:$16 sps:$4 sm:$0xff]   ;;  %v2866_v53 = vld [vmem:[#allocation9 + $0x32c] ss:$16 sps:$4 sm:$0xff]   ;;  %v2360_v54 = vcombine.low %v3563_v16, %v3580_v40  ;;  %v2362_v16 = vcombine.low %v3585_v43, %v3614_v5 }
  0xe2   : > { %1142 = vmatpush1.bf16.msra.mxu0 %v2785_v63  ;;  %1215 = vmatpush1.bf16.msra.mxu1 %v2788_v0  ;;  %v2803_v63 = vld [vmem:[#allocation9 + $0xc0] ss:$16 sps:$4 sm:$0xff]   ;;  %v486_v0 = vpack.c.bf16 %v464_v38, %v466_v46  ;;  %v3661_v1 = vpack.c.bf16 %v1301_v51, %v1303_v50  ;;  %v2844_v38 = vld [vmem:[#allocation9 + $0x2c8] ss:$16 sps:$4 sm:$0xff]   ;;  %v2849_v42 = vld [vmem:[#allocation9 + $0x2e4] ss:$16 sps:$4 sm:$0xff]  }
  0xe3   : > { %1143 = vmatprep.subr.bf16.mxu0 %v2793_v12  ;;  %1216 = vmatprep.subr.bf16.mxu1 %v2796_v13  ;;  %v2812_v12 = vld [vmem:[#allocation9 + $0xe8] ss:$16 sps:$4 sm:$0xff]   ;;  %v2817_v13 = vld [vmem:[#allocation9 + $0x104] ss:$16 sps:$4 sm:$0xff]   ;;  %v2847_v46 = vld [vmem:[#allocation9 + $0x2e0] ss:$16 sps:$4 sm:$0xff]  }
  0xe4   : > { %v2857_v49 = vld [vmem:[#allocation9 + $0x304] ss:$16 sps:$4 sm:$0xff]   ;;  %v2864_v57 = vld [vmem:[#allocation9 + $0x328] ss:$16 sps:$4 sm:$0xff]   ;;  %v2869_v40 = vld [vmem:[#allocation9 + $0x340] ss:$16 sps:$4 sm:$0xff]  }
  0xe5   : > { %794 = vmatmul.mubr.bf16.gmra.mrb[8].mxu0 %v484_v18  ;;  %867 = vmatmul.mubr.bf16.gmra.mrb[8].mxu1 %v484_v18  ;;  %v2818_v18 = vld [vmem:[#allocation9 + $0x108] ss:$16 sps:$4 sm:$0xff]   ;;  %v2863_v45 = vld [vmem:[#allocation9 + $0x324] ss:$16 sps:$4 sm:$0xff]  }
  0xe6   : > { %1144 = vmatpush1.bf16.msra.mxu0 %v2791_v26  ;;  %1217 = vmatpush1.bf16.msra.mxu1 %v2794_v27  ;;  %v2828_v26 = vld [vmem:[#allocation9 + $0x280] ss:$16 sps:$4 sm:$0xff]   ;;  %v2356_v27 = vcombine.low %v3509_v33, %v3512_v34  ;;  %v2846_v33 = vld [vmem:[#allocation9 + $0x2cc] ss:$16 sps:$4 sm:$0xff]   ;;  %v2871_v50 = vld [vmem:[#allocation9 + $0x344] ss:$16 sps:$4 sm:$0xff]  }
  0xe7   : > { %1145 = vmatprep.subr.bf16.mxu0 %v2799_v31  ;;  %1218 = vmatprep.subr.bf16.mxu1 %v2802_v32  ;;  %v2840_v31 = vld [vmem:[#allocation9 + $0x2ac] ss:$16 sps:$4 sm:$0xff]   ;;  %v2835_v32 = vld [vmem:[#allocation9 + $0x2a0] ss:$16 sps:$4 sm:$0xff]   ;;  %v2872_v51 = vld [vmem:[#allocation9 + $0x348] ss:$16 sps:$4 sm:$0xff]  }
  0xe8   : > { %2351 = vmatprep.mubr.msk.bf16.mxu0 %vm728_vm0, %v487_v37  ;;  %2355 = vmatprep.mubr.msk.bf16.mxu1 %vm728_vm0, %v487_v37  ;;  %v2843_v37 = vld [vmem:[#allocation9 + $0x2c4] ss:$16 sps:$4 sm:$0xff]   ;;  %v2841_v34 = vld [vmem:[#allocation9 + $0x2c0] ss:$16 sps:$4 sm:$0xff]   ;;  %v2878_v2 = vld [vmem:[#allocation9 + $0x368] ss:$16 sps:$4 sm:$0xff]  }
  0xe9   : > { %v2877_v62 = vld [vmem:[#allocation9 + $0x364] ss:$16 sps:$4 sm:$0xff]  }
  0xea   : > { %1146 = vmatpush1.bf16.msra.mxu0 %v2797_v44  ;;  %1219 = vmatpush1.bf16.msra.mxu1 %v2800_v52  ;;  %v2852_v44 = vld [vmem:[#allocation9 + $0x2ec] ss:$16 sps:$4 sm:$0xff]  }
  0xeb   : > { %1147 = vmatprep.subr.bf16.mxu0 %v2805_v55  ;;  %1220 = vmatprep.subr.bf16.mxu1 %v2808_v56  ;;  %v2860_v52 = vld [vmem:[#allocation9 + $0x30c] ss:$16 sps:$4 sm:$0xff]   ;;  %v2363_v55 = vcombine.high %v3585_v43, %v3614_v5  ;;  %v2861_v56 = vld [vmem:[#allocation9 + $0x320] ss:$16 sps:$4 sm:$0xff]   ;;  %v2886_v5 = vld [vmem:[#allocation9 + $0x388] ss:$16 sps:$4 sm:$0xff]  }
  0xec   : > { %v2883_v43 = vld [vmem:[#allocation9 + $0x380] ss:$16 sps:$4 sm:$0xff]  }
  0xed   : > { %804 = vmatmul.mubr.bf16.gmra.mrb[12].mxu0 %v486_v0  ;;  %877 = vmatmul.mubr.bf16.gmra.mrb[12].mxu1 %v486_v0  ;;  %v2875_v0 = vld [vmem:[#allocation9 + $0x360] ss:$16 sps:$4 sm:$0xff]  }
  0xee   : > { %1148 = vmatpush1.bf16.msra.mxu0 %v2803_v63  ;;  %1221 = vmatpush1.bf16.msra.mxu1 %v2806_v3  ;;  %v2880_v63 = vld [vmem:[#allocation9 + $0x36c] ss:$16 sps:$4 sm:$0xff]   ;;  %v2885_v3 = vld [vmem:[#allocation9 + $0x384] ss:$16 sps:$4 sm:$0xff]  }
  0xef   : > { %1149 = vmatprep.subr.bf16.mxu0 %v2811_v7  ;;  %1222 = vmatprep.subr.bf16.mxu1 %v2814_v8  ;;  %v2888_v7 = vld [vmem:[#allocation9 + $0x38c] ss:$16 sps:$4 sm:$0xff]   ;;  %v2891_v8 = vld [vmem:[#allocation9 + $0x3a4] ss:$16 sps:$4 sm:$0xff]  }
  0xf0   : > { %2404 = vmatprep.mubr.msk.bf16.mxu0 %vm728_vm0, %v2357_v9  ;;  %2408 = vmatprep.mubr.msk.bf16.mxu1 %vm728_vm0, %v2357_v9  ;;  %v2894_v9 = vld [vmem:[#allocation9 + $0x3ac] ss:$16 sps:$4 sm:$0xff]  }
  0xf2   : > { %1150 = vmatpush1.bf16.msra.mxu0 %v2809_v11  ;;  %1223 = vmatpush1.bf16.msra.mxu1 %v2812_v12  ;;  %v2889_v11 = vld [vmem:[#allocation9 + $0x3a0] ss:$16 sps:$4 sm:$0xff]   ;;  %v2892_v12 = vld [vmem:[#allocation9 + $0x3a8] ss:$16 sps:$4 sm:$0xff]  }
  0xf3   : > { %1151 = vmatprep.subr.bf16.mxu0 %v2817_v13  ;;  %1224 = vmatprep.subr.bf16.mxu1 %v2820_v14  ;;  %v2895_v13 = vld [vmem:[#allocation10 + $0x40] sm:$0xff]  }
  0xf4   : > { %v2896_v14 = vld [vmem:[#allocation10] sm:$0xff]  }
  0xf6   : > { %1152 = vmatpush1.bf16.msra.mxu0 %v2815_v17  ;;  %1225 = vmatpush1.bf16.msra.mxu1 %v2818_v18  ;;  %v2898_v17 = vld [vmem:[#allocation10 + $0x8] sm:$0xff]   ;;  %v2899_v18 = vld [vmem:[#allocation10 + $0x50] sm:$0xff]  }
  0xf7   : > { %1153 = vmatprep.subr.bf16.mxu0 %v2823_v19  ;;  %1226 = vmatprep.subr.bf16.mxu1 %v2826_v20  ;;  %v2900_v19 = vld [vmem:[#allocation10 + $0x10] sm:$0xff]   ;;  %v2901_v20 = vld [vmem:[#allocation10 + $0x58] sm:$0xff]  }
  0xfa   : > { %1154 = vmatpush1.bf16.msra.mxu0 %v2821_v21  ;;  %1227 = vmatpush1.bf16.msra.mxu1 %v2824_v22  ;;  %v2904_v21 = vld [vmem:[#allocation10 + $0x20] sm:$0xff]   ;;  %v2905_v22 = vld [vmem:[#allocation10 + $0x68] sm:$0xff]  }
  0xfb   : > { %1576 = vmatprep.subr.bf16.mxu0 %v2830_v23  ;;  %1649 = vmatprep.subr.bf16.mxu1 %v2833_v24  ;;  %v2908_v23 = vld [vmem:[#allocation10 + $0x30] sm:$0xff]   ;;  %v2910_v24 = vld [vmem:[#allocation10 + $0x38] sm:$0xff]  }
  0xfd   : > { %1168 = vmatmul.mubr.bf16.vlgmr.msra.gmra.mrb[0].mxu0 %v2356_v27  ;;  %1241 = vmatmul.mubr.bf16.vlgmr.msra.gmra.mrb[0].mxu1 %v2356_v27 }
  0xfe   : > { %1577 = vmatpush1.bf16.msra.mxu0 %v2828_v26  ;;  %1650 = vmatpush1.bf16.msra.mxu1 %v2831_v28 }
  0xff   : > { %1578 = vmatprep.subr.bf16.mxu0 %v2837_v30  ;;  %1651 = vmatprep.subr.bf16.mxu1 %v2840_v31 }
 0x100   : > { %2405 = vmatprep.mubr.msk.bf16.mxu0 %vm728_vm0, %v2359_v61  ;;  %2409 = vmatprep.mubr.msk.bf16.mxu1 %vm728_vm0, %v2359_v61 }
 0x102   : > { %1579 = vmatpush1.bf16.msra.mxu0 %v2835_v32  ;;  %1652 = vmatpush1.bf16.msra.mxu1 %v2838_v36 }
 0x103   : > { %1580 = vmatprep.subr.bf16.mxu0 %v2843_v37  ;;  %1653 = vmatprep.subr.bf16.mxu1 %v2846_v33 }
 0x105   : > { %1178 = vmatmul.mubr.bf16.gmra.mrb[4].mxu0 %v2358_v39  ;;  %1251 = vmatmul.mubr.bf16.gmra.mrb[4].mxu1 %v2358_v39 }
 0x106   : > { %1581 = vmatpush1.bf16.msra.mxu0 %v2841_v34  ;;  %1654 = vmatpush1.bf16.msra.mxu1 %v2844_v38 }
 0x107   : > { %1582 = vmatprep.subr.bf16.mxu0 %v2849_v42  ;;  %1655 = vmatprep.subr.bf16.mxu1 %v2852_v44 }
 0x108   : > { %2406 = vmatprep.mubr.msk.bf16.mxu0 %vm728_vm0, %v2361_v47  ;;  %2410 = vmatprep.mubr.msk.bf16.mxu1 %vm728_vm0, %v2361_v47 }
 0x10a   : > { %1583 = vmatpush1.bf16.msra.mxu0 %v2847_v46  ;;  %1656 = vmatpush1.bf16.msra.mxu1 %v2850_v48 }
 0x10b   : > { %1584 = vmatprep.subr.bf16.mxu0 %v2857_v49  ;;  %1657 = vmatprep.subr.bf16.mxu1 %v2860_v52 }
 0x10d   : > { %1188 = vmatmul.mubr.bf16.gmra.mrb[8].mxu0 %v2360_v54  ;;  %1261 = vmatmul.mubr.bf16.gmra.mrb[8].mxu1 %v2360_v54 }
 0x10e   : > { %1585 = vmatpush1.bf16.msra.mxu0 %v2855_v35  ;;  %1658 = vmatpush1.bf16.msra.mxu1 %v2858_v15 }
 0x10f   : > { %1586 = vmatprep.subr.bf16.mxu0 %v2863_v45  ;;  %1659 = vmatprep.subr.bf16.mxu1 %v2866_v53 }
 0x110   : > { %2407 = vmatprep.mubr.msk.bf16.mxu0 %vm728_vm0, %v2363_v55  ;;  %2411 = vmatprep.mubr.msk.bf16.mxu1 %vm728_vm0, %v2363_v55 }
 0x112   : > { %1587 = vmatpush1.bf16.msra.mxu0 %v2861_v56  ;;  %1660 = vmatpush1.bf16.msra.mxu1 %v2864_v57 }
 0x113   : > { %1588 = vmatprep.subr.bf16.mxu0 %v2871_v50  ;;  %1661 = vmatprep.subr.bf16.mxu1 %v2874_v58 }
 0x115   : > { %1198 = vmatmul.mubr.bf16.gmra.mrb[12].mxu0 %v2362_v16  ;;  %1271 = vmatmul.mubr.bf16.gmra.mrb[12].mxu1 %v2362_v16 }
 0x116   : > { %1589 = vmatpush1.bf16.msra.mxu0 %v2869_v40  ;;  %1662 = vmatpush1.bf16.msra.mxu1 %v2872_v51 }
 0x117   : > { %1590 = vmatprep.subr.bf16.mxu0 %v2877_v62  ;;  %1663 = vmatprep.subr.bf16.mxu1 %v2880_v63 }
 0x118   : > { %2452 = vmatprep.mubr.msk.bf16.mxu0 %vm728_vm0, %v3548_v4  ;;  %2456 = vmatprep.mubr.msk.bf16.mxu1 %vm728_vm0, %v3548_v4  ;;  %v2897_v4 = vld [vmem:[#allocation10 + $0x48] sm:$0xff]  }
 0x11a   : > { %1591 = vmatpush1.bf16.msra.mxu0 %v2875_v0  ;;  %1664 = vmatpush1.bf16.msra.mxu1 %v2878_v2 }
 0x11b   : > { %1592 = vmatprep.subr.bf16.mxu0 %v2885_v3  ;;  %1665 = vmatprep.subr.bf16.mxu1 %v2888_v7 }
 0x11e   : > { %1593 = vmatpush1.bf16.msra.mxu0 %v2883_v43  ;;  %1666 = vmatpush1.bf16.msra.mxu1 %v2886_v5 }
 0x11f   : > { %1594 = vmatprep.subr.bf16.mxu0 %v2891_v8  ;;  %1667 = vmatprep.subr.bf16.mxu1 %v2894_v9 }
 0x122   : > { %1595 = vmatpush1.bf16.msra.mxu0 %v2889_v11  ;;  %1668 = vmatpush1.bf16.msra.mxu1 %v2892_v12 }
 0x123   : > { %2483 = vmatprep.subr.bf16.mxu0 %v2895_v13  ;;  %2523 = vmatprep.subr.bf16.mxu1 %v2895_v13 }
 0x125   : > { %1609 = vmatmul.mubr.bf16.vlgmr.msra.gmra.mrb[0].mxu0 %v3557_v10  ;;  %1682 = vmatmul.mubr.bf16.vlgmr.msra.gmra.mrb[0].mxu1 %v3557_v10  ;;  %v2902_v10 = vld [vmem:[#allocation10 + $0x18] sm:$0xff]  }
 0x126   : > { %2453 = vmatprep.mubr.msk.bf16.mxu0 %vm728_vm0, %v3601_v60  ;;  %2457 = vmatprep.mubr.msk.bf16.mxu1 %vm728_vm0, %v3601_v60  ;;  %v2903_v60 = vld [vmem:[#allocation10 + $0x60] sm:$0xff]  }
 0x127   : > { %2484 = vmatpush3.bf16.msra.mxu0 %v2896_v14  ;;  %2531 = vmatpush3.bf16.msra.mxu1 %v2896_v14 }
 0x128   : > { %2485 = vmatprep.subr.bf16.mxu0 %v2897_v4  ;;  %2524 = vmatprep.subr.bf16.mxu1 %v2897_v4 }
 0x12b   : > { %2486 = vmatpush3.bf16.msra.mxu0 %v2898_v17  ;;  %2532 = vmatpush3.bf16.msra.mxu1 %v2898_v17 }
 0x12c   : > { %2487 = vmatprep.subr.bf16.mxu0 %v2899_v18  ;;  %2525 = vmatprep.subr.bf16.mxu1 %v2899_v18 }
 0x12d   : > { %1619 = vmatmul.mubr.bf16.gmra.mrb[4].mxu0 %v3626_v25  ;;  %1692 = vmatmul.mubr.bf16.gmra.mrb[4].mxu1 %v3626_v25  ;;  %v2906_v25 = vld [vmem:[#allocation10 + $0x28] sm:$0xff]  }
 0x12e   : > { %2454 = vmatprep.mubr.msk.bf16.mxu0 %vm728_vm0, %v3645_v41  ;;  %2458 = vmatprep.mubr.msk.bf16.mxu1 %vm728_vm0, %v3645_v41  ;;  %v2907_v41 = vld [vmem:[#allocation10 + $0x70] sm:$0xff]  }
 0x12f   : > { %2488 = vmatpush3.bf16.msra.mxu0 %v2900_v19  ;;  %2533 = vmatpush3.bf16.msra.mxu1 %v2900_v19 }
 0x130   : > { %2489 = vmatprep.subr.bf16.mxu0 %v2901_v20  ;;  %2526 = vmatprep.subr.bf16.mxu1 %v2901_v20 }
 0x133   : > { %2490 = vmatpush3.bf16.msra.mxu0 %v2902_v10  ;;  %2534 = vmatpush3.bf16.msra.mxu1 %v2902_v10 }
 0x134   : > { %2491 = vmatprep.subr.bf16.mxu0 %v2903_v60  ;;  %2527 = vmatprep.subr.bf16.mxu1 %v2903_v60 }
 0x135   : > { %1629 = vmatmul.mubr.bf16.gmra.mrb[8].mxu0 %v3655_v59  ;;  %1702 = vmatmul.mubr.bf16.gmra.mrb[8].mxu1 %v3655_v59  ;;  %v2909_v59 = vld [vmem:[#allocation10 + $0x78] sm:$0xff]  }
 0x136   : > { %2455 = vmatprep.mubr.msk.bf16.mxu0 %vm728_vm0, %v3661_v1  ;;  %2459 = vmatprep.mubr.msk.bf16.mxu1 %vm728_vm0, %v3661_v1 }
 0x137   : > { %2492 = vmatpush3.bf16.msra.mxu0 %v2904_v21  ;;  %2535 = vmatpush3.bf16.msra.mxu1 %v2904_v21 }
 0x138   : > { %2493 = vmatprep.subr.bf16.mxu0 %v2905_v22  ;;  %2528 = vmatprep.subr.bf16.mxu1 %v2905_v22 }
 0x13b   : > { %2494 = vmatpush3.bf16.msra.mxu0 %v2906_v25  ;;  %2536 = vmatpush3.bf16.msra.mxu1 %v2906_v25 }
 0x13c   : > { %2495 = vmatprep.subr.bf16.mxu0 %v2907_v41  ;;  %2529 = vmatprep.subr.bf16.mxu1 %v2907_v41 }
 0x13d   : > { %1639 = vmatmul.mubr.bf16.gmra.mrb[12].mxu0 %v3665_v6  ;;  %1712 = vmatmul.mubr.bf16.gmra.mrb[12].mxu1 %v3665_v6 }
 0x13f   : > { %2496 = vmatpush3.bf16.msra.mxu0 %v2908_v23  ;;  %2537 = vmatpush3.bf16.msra.mxu1 %v2908_v23 }
 0x140   : > { %2497 = vmatprep.subr.bf16.mxu0 %v2909_v59  ;;  %2530 = vmatprep.subr.bf16.mxu1 %v2909_v59 }
 0x143   : > { %2498 = vmatpush3.bf16.msra.mxu0 %v2910_v24  ;;  %2538 = vmatpush3.bf16.msra.mxu1 %v2910_v24 }
 0x1f8   : > { %v1610_v1 = vpop.f32.mrb[0].mxu0  ;;  %v1683_v26 = vpop.f32.mrb[0].mxu1 }
 0x1f9   : > { %v1754_v27 = vmul.f32 %v1610_v1, %v1610_v1  ;;  %v1770_v28 = vmul.f32 %v1683_v26, %v1683_v26  ;;  %v1612_v6 = vpop.f32.mrb[1].mxu0  ;;  %v1685_v30 = vpop.f32.mrb[1].mxu1 }
 0x1fa   : > { %v1755_v31 = vmul.f32 %v1612_v6, %v1612_v6  ;;  %v1771_v32 = vmul.f32 %v1685_v30, %v1685_v30  ;;  %v1614_v61 = vpop.f32.mrb[2].mxu0  ;;  %v1687_v36 = vpop.f32.mrb[2].mxu1 }
 0x1fb   : > { %v1786_v37 = vadd.f32 %v1770_v28, %v1754_v27  ;;  %v1756_v33 = vmul.f32 %v1614_v61, %v1614_v61  ;;  %v1772_v34 = vmul.f32 %v1687_v36, %v1687_v36  ;;  %v1616_v38 = vpop.f32.mrb[3].mxu0  ;;  %v1689_v39 = vpop.f32.mrb[3].mxu1 }
 0x1fc   : > { %v1787_v42 = vadd.f32 %v1771_v32, %v1755_v31  ;;  %v1757_v44 = vmul.f32 %v1616_v38, %v1616_v38  ;;  %v1773_v46 = vmul.f32 %v1689_v39, %v1689_v39 }
 0x1fd   : > { %v1788_v47 = vadd.f32 %v1772_v34, %v1756_v33 }
 0x1fe   : > { %v1789_v48 = vadd.f32 %v1773_v46, %v1757_v44 }
 0x1ff   : > { %v1802_v49 = vpack.c.bf16 %v1788_v47, %v1786_v37 }
 0x200   : > { %v1620_v52 = vpop.f32.mrb[4].mxu0  ;;  %v1693_v35 = vpop.f32.mrb[4].mxu1  ;;  %v1803_v15 = vpack.c.bf16 %v1789_v48, %v1787_v42 }
 0x201   : > { %v1758_v45 = vmul.f32 %v1620_v52, %v1620_v52  ;;  %v1774_v53 = vmul.f32 %v1693_v35, %v1693_v35  ;;  %v1622_v54 = vpop.f32.mrb[5].mxu0  ;;  %v1695_v55 = vpop.f32.mrb[5].mxu1 }
 0x202   : > { %v1759_v56 = vmul.f32 %v1622_v54, %v1622_v54  ;;  %v1775_v57 = vmul.f32 %v1695_v55, %v1695_v55  ;;  %v1624_v50 = vpop.f32.mrb[6].mxu0  ;;  %v1697_v58 = vpop.f32.mrb[6].mxu1  ;;  %1970 = vmatprep.mubr.bf16.mxu0 %v1803_v15 }
 0x203   : > { %v1790_v16 = vadd.f32 %v1774_v53, %v1758_v45  ;;  %v1760_v40 = vmul.f32 %v1624_v50, %v1624_v50  ;;  %v1776_v51 = vmul.f32 %v1697_v58, %v1697_v58  ;;  %v1626_v62 = vpop.f32.mrb[7].mxu0  ;;  %v1699_v63 = vpop.f32.mrb[7].mxu1  ;;  %1971 = vmatmul.mubr.bf16.vlgmr.msra.gmra.mrb[16].mxu0 %v1802_v49  ;;  %v3195_v53 = vmov 0.0  }
 0x204   : > { %v1791_v0 = vadd.f32 %v1775_v57, %v1759_v56  ;;  %v1761_v2 = vmul.f32 %v1626_v62, %v1626_v62  ;;  %v1777_v3 = vmul.f32 %v1699_v63, %v1699_v63  ;;  %2081 = vst [vmem:[%s3716_s12] sm:$0x1] %v3195_v53 }
 0x205   : > { %v1792_v7 = vadd.f32 %v1776_v51, %v1760_v40 }
 0x206   : > { %v1793_v43 = vadd.f32 %v1777_v3, %v1761_v2 }
 0x207   : > { %v1804_v5 = vpack.c.bf16 %v1792_v7, %v1790_v16 }
 0x208   : > { %v1630_v8 = vpop.f32.mrb[8].mxu0  ;;  %v1703_v9 = vpop.f32.mrb[8].mxu1  ;;  %v1805_v11 = vpack.c.bf16 %v1793_v43, %v1791_v0 }
 0x209   : > { %v1762_v12 = vmul.f32 %v1630_v8, %v1630_v8  ;;  %v1778_v13 = vmul.f32 %v1703_v9, %v1703_v9  ;;  %v1632_v14 = vpop.f32.mrb[9].mxu0  ;;  %v1705_v4 = vpop.f32.mrb[9].mxu1  ;;  %v2036_v9 = vadd.s32 8, %v3506_v29 }
 0x20a   : > { %v1763_v17 = vmul.f32 %v1632_v14, %v1632_v14  ;;  %v1779_v18 = vmul.f32 %v1705_v4, %v1705_v4  ;;  %v1634_v19 = vpop.f32.mrb[10].mxu0  ;;  %v1707_v20 = vpop.f32.mrb[10].mxu1  ;;  %1978 = vmatprep.mubr.bf16.mxu0 %v1805_v11 }
 0x20b   : > { %v1794_v10 = vadd.f32 %v1778_v13, %v1762_v12  ;;  %v1764_v60 = vmul.f32 %v1634_v19, %v1634_v19  ;;  %v1780_v21 = vmul.f32 %v1707_v20, %v1707_v20  ;;  %v1636_v22 = vpop.f32.mrb[11].mxu0  ;;  %v1709_v25 = vpop.f32.mrb[11].mxu1  ;;  %1979 = vmatmul.mubr.bf16.gmra.mrb[20].mxu0 %v1804_v5  ;;  %v3720_v5 = vstv %s375_s14 }
 0x20c   : > { %v1795_v41 = vadd.f32 %v1779_v18, %v1763_v17  ;;  %v1765_v23 = vmul.f32 %v1636_v22, %v1636_v22  ;;  %v1781_v59 = vmul.f32 %v1709_v25, %v1709_v25  ;;  %vm2053_vm3 = vcmp.lt.s32.totalorder %v3506_v29, %v3720_v5 }
 0x20d   : > { %v1796_v24 = vadd.f32 %v1780_v21, %v1764_v60  ;;  %vm2054_vm4 = vcmp.lt.s32.totalorder %v2036_v9, %v3720_v5  ;;  %v2037_v25 = vadd.s32 16, %v3506_v29 }
 0x20e   : > { %v1797_v1 = vadd.f32 %v1781_v59, %v1765_v23 }
 0x20f   : > { %v1806_v26 = vpack.c.bf16 %v1796_v24, %v1794_v10  ;;  %vm2055_vm5 = vcmp.lt.s32.totalorder %v2037_v25, %v3720_v5 }
 0x210   : > { %v1640_v27 = vpop.f32.mrb[12].mxu0  ;;  %v1713_v28 = vpop.f32.mrb[12].mxu1  ;;  %v1807_v6 = vpack.c.bf16 %v1797_v1, %v1795_v41  ;;  %v2038_v1 = vadd.s32 24, %v3506_v29 }
 0x211   : > { %v1766_v30 = vmul.f32 %v1640_v27, %v1640_v27  ;;  %v1782_v31 = vmul.f32 %v1713_v28, %v1713_v28  ;;  %v1642_v32 = vpop.f32.mrb[13].mxu0  ;;  %v1715_v61 = vpop.f32.mrb[13].mxu1 }
 0x212   : > { %v1767_v36 = vmul.f32 %v1642_v32, %v1642_v32  ;;  %v1783_v37 = vmul.f32 %v1715_v61, %v1715_v61  ;;  %v1644_v33 = vpop.f32.mrb[14].mxu0  ;;  %v1717_v34 = vpop.f32.mrb[14].mxu1  ;;  %1986 = vmatprep.mubr.bf16.mxu1 %v1807_v6  ;;  %vm2056_vm6 = vcmp.lt.s32.totalorder %v2038_v1, %v3720_v5 }
 0x213   : > { %v1798_v38 = vadd.f32 %v1782_v31, %v1766_v30  ;;  %v1768_v39 = vmul.f32 %v1644_v33, %v1644_v33  ;;  %v1784_v42 = vmul.f32 %v1717_v34, %v1717_v34  ;;  %v1646_v44 = vpop.f32.mrb[15].mxu0  ;;  %v1719_v46 = vpop.f32.mrb[15].mxu1  ;;  %1987 = vmatmul.mubr.bf16.vlgmr.msra.gmra.mrb[16].mxu1 %v1806_v26 }
 0x214   : > { %v1799_v47 = vadd.f32 %v1783_v37, %v1767_v36  ;;  %v1769_v48 = vmul.f32 %v1646_v44, %v1646_v44  ;;  %v1785_v49 = vmul.f32 %v1719_v46, %v1719_v46 }
 0x215   : > { %v1800_v52 = vadd.f32 %v1784_v42, %v1768_v39  ;;  %v2039_v42 = vadd.s32 32, %v3506_v29 }
 0x216   : > { %v1801_v35 = vadd.f32 %v1785_v49, %v1769_v48  ;;  %v2040_v49 = vadd.s32 40, %v3506_v29 }
 0x217   : > { %v1808_v15 = vpack.c.bf16 %v1800_v52, %v1798_v38  ;;  %vm2057_vm7 = vcmp.lt.s32.totalorder %v2039_v42, %v3720_v5 }
 0x218   : > { %v1809_v45 = vpack.c.bf16 %v1801_v35, %v1799_v47  ;;  %vm2058_vm8 = vcmp.lt.s32.totalorder %v2040_v49, %v3720_v5 }
 0x21a   : > { %1994 = vmatprep.mubr.bf16.mxu1 %v1809_v45 }
 0x21b   : > { %1995 = vmatmul.mubr.bf16.gmra.mrb[20].mxu1 %v1808_v15 }
 0x2d6   : > { %v2499_v54 = vpop.f32.mrb[16].mxu0 }
 0x2d7   : > { %v2500_v55 = vpop.f32.mrb[17].mxu0 }
 0x2d8   : > { %v2501_v56 = vadd.f32 %v2500_v55, %v2499_v54  ;;  %v2502_v57 = vpop.f32.mrb[18].mxu0 }
 0x2d9   : > { %v2503_v50 = vpop.f32.mrb[19].mxu0 }
 0x2da   : > { %v2003_v58 = vmax.f32 %v2501_v56, 1e-10  ;;  %v2504_v16 = vadd.f32 %v2503_v50, %v2502_v57  ;;  %v2041_v56 = vadd.s32 48, %v3506_v29 }
 0x2dc   : > { %2911 = vlog2.f32 %v2003_v58  ;;  %v2004_v40 = vmax.f32 %v2504_v16, 1e-10  ;;  %v2042_v16 = vadd.s32 56, %v3506_v29  ;;  %vm2059_vm9 = vcmp.lt.s32.totalorder %v2041_v56, %v3720_v5 }
 0x2de   : > { %2913 = vlog2.f32 %v2004_v40  ;;  %v2505_v51 = vpop.f32.mrb[20].mxu0  ;;  %vm2060_vm10 = vcmp.lt.s32.totalorder %v2042_v16, %v3720_v5 }
 0x2df   : > { %v2506_v62 = vpop.f32.mrb[21].mxu0 }
 0x2e0   : > { %v2507_v63 = vadd.f32 %v2506_v62, %v2505_v51  ;;  %v2508_v0 = vpop.f32.mrb[22].mxu0 }
 0x2e1   : > { %v2509_v2 = vpop.f32.mrb[23].mxu0 }
 0x2e2   : > { %v2005_v3 = vmax.f32 %v2507_v63, 1e-10  ;;  %v2510_v7 = vadd.f32 %v2509_v2, %v2508_v0 }
 0x2e4   : > { %2915 = vlog2.f32 %v2005_v3  ;;  %v2006_v43 = vmax.f32 %v2510_v7, 1e-10 }
 0x2e6   : > { %v2912_v8 = vpop.eup %2911  ;;  %2917 = vlog2.f32 %v2006_v43  ;;  %v2511_v11 = vpop.f32.mrb[16].mxu1 }
 0x2e7   : > { %v2012_v12 = vmul.f32 0.6931472, %v2912_v8  ;;  %v2512_v13 = vpop.f32.mrb[17].mxu1 }
 0x2e8   : > { %v2914_v14 = vpop.eup %2913  ;;  %v2513_v4 = vadd.f32 %v2512_v13, %v2511_v11  ;;  %v2514_v17 = vpop.f32.mrb[18].mxu1 }
 0x2e9   : > { %v2027_v18 = vmul.f32 0.4342945, %v2012_v12  ;;  %v2014_v19 = vmul.f32 0.6931472, %v2914_v14  ;;  %v2515_v20 = vpop.f32.mrb[19].mxu1 }
 0x2ea   : > { %v2007_v10 = vmax.f32 %v2513_v4, 1e-10  ;;  %v2516_v60 = vadd.f32 %v2515_v20, %v2514_v17 }
 0x2eb   : > { %v2061_v21 = vsel %vm2053_vm3, %v2027_v18, 0.0  ;;  %v2028_v22 = vmul.f32 0.4342945, %v2014_v19 }
 0x2ec   : > { %2069 = vst [vmem:[%s3728_s22] sm:$0xff] %v2061_v21  ;;  %2919 = vlog2.f32 %v2007_v10  ;;  %v2008_v41 = vmax.f32 %v2516_v60, 1e-10 }
 0x2ed   : > { %v2062_v23 = vsel %vm2054_vm4, %v2028_v22, 0.0 }
 0x2ee   : > { %v2916_v59 = vpop.eup %2915  ;;  %2070 = vst [vmem:[%s3728_s22 + $0x8] sm:$0xff] %v2062_v23  ;;  %v2083_v24 = vadd.f32 %v2062_v23, %v2061_v21  ;;  %2921 = vlog2.f32 %v2008_v41  ;;  %v2517_v26 = vpop.f32.mrb[20].mxu1 }
 0x2ef   : > { %v2016_v27 = vmul.f32 0.6931472, %v2916_v59  ;;  %v2518_v28 = vpop.f32.mrb[21].mxu1 }
 0x2f0   : > { %v2918_v6 = vpop.eup %2917  ;;  %v2519_v30 = vadd.f32 %v2518_v28, %v2517_v26  ;;  %v2520_v31 = vpop.f32.mrb[22].mxu1 }
 0x2f1   : > { %v2029_v32 = vmul.f32 0.4342945, %v2016_v27  ;;  %v2018_v61 = vmul.f32 0.6931472, %v2918_v6  ;;  %v2521_v36 = vpop.f32.mrb[23].mxu1 }
 0x2f2   : > { %v2009_v37 = vmax.f32 %v2519_v30, 1e-10  ;;  %v2522_v33 = vadd.f32 %v2521_v36, %v2520_v31 }
 0x2f3   : > { %v2063_v34 = vsel %vm2055_vm5, %v2029_v32, 0.0  ;;  %v2030_v38 = vmul.f32 0.4342945, %v2018_v61 }
 0x2f4   : > { %2071 = vst [vmem:[%s3728_s22 + $0x10] sm:$0xff] %v2063_v34  ;;  %v2084_v39 = vadd.f32 %v2083_v24, %v2063_v34  ;;  %2923 = vlog2.f32 %v2009_v37  ;;  %v2010_v44 = vmax.f32 %v2522_v33, 1e-10 }
 0x2f5   : > { %v2064_v46 = vsel %vm2056_vm6, %v2030_v38, 0.0 }
 0x2f6   : > { %v2920_v47 = vpop.eup %2919  ;;  %2072 = vst [vmem:[%s3728_s22 + $0x18] sm:$0xff] %v2064_v46  ;;  %v2085_v48 = vadd.f32 %v2084_v39, %v2064_v46  ;;  %2925 = vlog2.f32 %v2010_v44 }
 0x2f7   : > { %v2020_v52 = vmul.f32 0.6931472, %v2920_v47 }
 0x2f8   : > { %v2922_v35 = vpop.eup %2921 }
 0x2f9   : > { %v2031_v15 = vmul.f32 0.4342945, %v2020_v52  ;;  %v2022_v45 = vmul.f32 0.6931472, %v2922_v35 }
 0x2fb   : > { %v2065_v53 = vsel %vm2057_vm7, %v2031_v15, 0.0  ;;  %v2032_v54 = vmul.f32 0.4342945, %v2022_v45 }
 0x2fc   : > { %2073 = vst [vmem:[%s3728_s22 + $0x20] sm:$0xff] %v2065_v53  ;;  %v2086_v55 = vadd.f32 %v2085_v48, %v2065_v53 }
 0x2fd   : > { %v2066_v57 = vsel %vm2058_vm8, %v2032_v54, 0.0 }
 0x2fe   : > { %v2924_v50 = vpop.eup %2923  ;;  %2074 = vst [vmem:[%s3728_s22 + $0x28] sm:$0xff] %v2066_v57  ;;  %v2087_v58 = vadd.f32 %v2086_v55, %v2066_v57 }
 0x2ff   : > { %v2024_v40 = vmul.f32 0.6931472, %v2924_v50 }
 0x300   : > { %v2926_v51 = vpop.eup %2925 }
 0x301   : > { %v2033_v62 = vmul.f32 0.4342945, %v2024_v40  ;;  %v2026_v63 = vmul.f32 0.6931472, %v2926_v51 }
 0x303   : > { %v2067_v0 = vsel %vm2059_vm9, %v2033_v62, 0.0  ;;  %v2034_v2 = vmul.f32 0.4342945, %v2026_v63 }
 0x304   : > { %2075 = vst [vmem:[%s3728_s22 + $0x30] sm:$0xff] %v2067_v0  ;;  %v2088_v29 = vadd.f32 %v2087_v58, %v2067_v0 }
 0x305   : > { %v2068_v3 = vsel %vm2060_vm10, %v2034_v2, 0.0 }
 0x306   : > { %2076 = vst [vmem:[%s3728_s22 + $0x38] sm:$0xff] %v2068_v3  ;;  %v2089_v7 = vadd.f32 %v2088_v29, %v2068_v3 }
 0x307   : > { %3067 = shalt.err (!%p3064_p10)
}
 0x308   : > { %s3068_s21 = scalar_lea.hbm %s3753_s3, 1024  ;;  %s3072_s4 = scalar_lea.hbm %s3844_s5, 2048 }
 0x309   : > { %p3069_p0 = scmp.ne.s32.totalorder %s3753_s3, %s3068_s21  ;;  %p3073_p1 = scmp.lt.u32.totalorder %s3753_s3, %s3844_s5 }
 0x30a   : > { %p3074_p2 = scmp.lt.u32.totalorder %s3072_s4, %s3068_s21  ;;  %p3076_p4 = scmp.lt.u32.totalorder %s3068_s21, %s3753_s3 }
 0x30b   : > { %p3070_p5 = pnand %p3069_p0, %p3874_p9 }
 0x30c   : > { %p3075_p3 = por %p3074_p2, %p3073_p1 }
 0x30d   : > { %p3071_p11 = pneg %p3070_p5 }
 0x30e   : > { %p3077_p13 = por %p3076_p4, %p3075_p3 }
 0x310   : > { %p3078_p6 = pnand %p3077_p13, %p3071_p11 }
 0x312   : > { %3081 = shalt.err (!%p3078_p6)
}
 0x313   : > { %s3197_s26 = smov 128   ;;  %s3198_s14 = smov 8   ;;  %v2090_v43 = vrot.slane %v2089_v7, 4  ;;  %v2082_v12 = vld [vmem:[%s3716_s12] sm:$0x1] }
 0x314   : > { %2616 = dma.vmem_to_hbm [thread:$0]  (%p3874_p9), %s3755_s24, 1024, %s3753_s3, %s2099_s17, %s3197_s26, %s3197_s26, %s3198_s14  }
 0x315   : > { %v2091_v5 = vadd.f32 %v2090_v43, %v2089_v7  ;;  %s2479_s22 = sshll.u32 %s3174_s10, 4  ;;  %s2134_s27 = sshll.u32 %s3716_s12, 4  ;;  %s3791_s27 = int_to_ptr.vmem [resolvable:$true] %s2134_s27 }
 0x316   : > { %s3789_s1 = scalar_lea.hbm %s3845_s6, %s2479_s22  ;;  %s2104_s24 = scalar_lea.sflag [#allocation14], %s3478_s9 }
 0x317   : > { %v2092_v8 = vrot.slane %v2091_v5, 2  ;;  %s3082_s3 = scalar_lea.vmem %s3791_s27, 16  ;;  %s3199_s10 = smov [#allocation13]  }
 0x318   : > { %p3083_p7 = scmp.ne.s32.totalorder %s3791_s27, %s3082_s3  ;;  %s3086_s17 = sshll.u32 %s3199_s10, 4  ;;  %s3087_s17 = int_to_ptr.vmem [resolvable:$false] %s3086_s17 }
 0x319   : > { %v2093_v9 = vadd.f32 %v2092_v8, %v2091_v5  ;;  %s3088_s25 = scalar_lea.vmem %s3087_s17, 32  ;;  %p3089_p10 = scmp.lt.s32.totalorder %s3791_s27, %s3087_s17 }
 0x31a   : > { %p3084_p12 = pnand %p3083_p7, %p3874_p9  ;;  %p3090_p0 = scmp.lt.s32.totalorder %s3088_s25, %s3082_s3 }
 0x31b   : > { %v2094_v11 = vrot.slane %v2093_v9, 1 }
 0x31c   : > { %p3085_p8 = pneg %p3084_p12  ;;  %p3091_p5 = por %p3090_p0, %p3089_p10 }
 0x31d   : > { %v2095_v13 = vadd.f32 %v2094_v11, %v2093_v9 }
 0x31e   : > { %p3092_p11 = pnand %p3091_p5, %p3085_p8 }
 0x31f   : > { %v2096_v14 = vadd.f32 %v2095_v13, %v2082_v12 }
 0x321   : > { %2097 = vst [vmem:[%s3716_s12] sm:$0x1] %v2096_v14 }
 0x322   : > { %3095 = shalt.err (!%p3092_p11)
}
 0x323   : > { %s3096_s9 = scalar_lea.hbm %s3789_s1, 16  ;;  %s3100_s23 = scalar_lea.hbm %s3845_s6, 32 }
 0x324   : > { %p3097_p1 = scmp.ne.s32.totalorder %s3789_s1, %s3096_s9  ;;  %p3101_p4 = scmp.lt.u32.totalorder %s3789_s1, %s3845_s6 }
 0x325   : > { %p3102_p13 = scmp.lt.u32.totalorder %s3100_s23, %s3096_s9  ;;  %p3104_p7 = scmp.lt.u32.totalorder %s3096_s9, %s3789_s1 }
 0x326   : > { %p3098_p2 = pnand %p3097_p1, %p3874_p9 }
 0x327   : > { %p3103_p6 = por %p3102_p13, %p3101_p4 }
 0x328   : > { %p3099_p3 = pneg %p3098_p2 }
 0x329   : > { %p3105_p12 = por %p3104_p7, %p3103_p6 }
 0x32b   : > { %p3106_p8 = pnand %p3105_p12, %p3099_p3 }
 0x32d   : > { %3109 = shalt.err (!%p3106_p8)
}
 0x32e   : > { %2617 = dma.vmem_to_hbm [thread:$0]  (%p3874_p9), %s3791_s27, 16, %s3789_s1, %s2104_s24  }
 0x32f PF: > { %s2146_s13 = sand.u32 1, %s3162_s7   ;;  %p3875_p10 = scmp.ne.s32.totalorder %s3857_s15, 0 }
 0x330   : > { %p3876_p0 = scmp.ge.s32.totalorder %s3182_s11, 2  ;;  %s2147_s4 = scalar_lea.sflag [#allocation6], %s2146_s13 }
 0x332   : > { %p2635_p5 = pnand %p3876_p0, %p3875_p10 }
 0x334   : > { %3153 = dma.done.wait (!%p2635_p5), %s2147_s4, 1024  }
 0x335   : > { %3155 = vsyncadd (!%p2635_p5), %s2147_s4, 4294966272  ;;  %s2156_s16 = scalar_lea.sflag [#allocation14], %s2146_s13 }
 0x336   : > { %3157 = dma.done.wait (!%p2635_p5), %s2156_s16, 16  }
 0x337   : > { %3159 = vsyncadd (!%p2635_p5), %s2156_s16, 4294967280  ;;  %s34_s11 = sadd.s32 1, %s3182_s11   ;;  %s3877_s19 = sld [smem:[#allocation22_spill]] }
 0x338   : > { %p31_p11 = scmp.ge.s32.totalorder %s34_s11, 4   ;;  %s3878_s9 = sld [smem:[#allocation24_spill]] }
 0x339   : > { %s3879_s20 = sld [smem:[#allocation23_spill]]  ;;  %s3880_s7 = smov %s3166_s8 }
 0x33a   : > { %s3882_s10 = smov %s3178_s0  ;;  %33 = sbr.rel (!%p31_p11) target bundleno = 24 (0x18), region = 123 }
 0x33d   : > { %s3881_s8 = smov %s3877_s19 }
 0x33f   : > { %s3883_s0 = smov %s3879_s20 }
 0x341   :  { %2160 = vsyncpa [#allocation5], 1 }
 0x342   :  { %2162 = vsyncpa [#allocation5 + $0x1], 1 }
 0x343   :  { %2163 = vsyncpa [#allocation8], 1 }
 0x344   :  { %2165 = vsyncpa [#allocation8 + $0x1], 1 }
 0x345   :  { %2166 = vsyncpa [#allocation11], 1 }
 0x346   :  { %2167 = vsyncpa [#allocation6], 1 }
 0x347   :  { %2169 = vsyncpa [#allocation6 + $0x1], 1 }
 0x348   :  { %2170 = vsyncpa [#allocation14], 1 }
 0x349   :  { %2172 = vsyncpa [#allocation14 + $0x1], 1 }

</bundles_post_ra>
